<compile_context>
chip_gen: v5e
topology: v5e:2x2
jax: 0.10.0
libtpu: 0.0.40
codegen_flags: <defaults>
</compile_context>

<pallas_src>
import functools

import numpy as np
import jax
import jax.numpy as jnp
from jax.experimental import pallas as pl
from jax.experimental.pallas import tpu as pltpu

EPS = 1e-5

# Column indices of the packed per-channel parameter matrix (each column has length C).
(G1_1A, G1_1B, B1_1A, B1_1B,          # branch-1 BN1 affine (yi half / yr half)
 G2_1A, G2_1B, B2_1A, B2_1B,          # branch-1 BN2 affine
 G1_2E, G1_2O, B1_2E, B1_2O,          # branch-2 BN1 affine (even=yi / odd=yr channels)
 G2_2E, G2_2O, B2_2E, B2_2O) = range(16)
_NSCALAR_COLS = 16


# ----------------------------------------------------------------------------
# Fused kernel:  GCU -> [BN1 -> AvgPool(3,1) -> grouped Conv1d(K) -> BN2] x 2 branches
# ----------------------------------------------------------------------------
def _gcu_fused_kernel(x_ref, pw_ref, w1_ref, o_ref, *, K, use_mxu):
    # x_ref : (B, C, L)          raw input (any float dtype; cast to f32 inside)
    # pw_ref: (C, 16 + 4K)       packed BN affine params + conv2 (groups=C) weights
    # w1_ref: (C, 2*K*C)         conv1 (groups=2) weights, tap-major (col k*C+i = w[o,i,k])
    # o_ref : (B, 4C, Lout_pad)  [y1a | y1b | y2 even | y2 odd], lane-padded to 128
    x = x_ref[...].astype(jnp.float32)
    B, C, L = x.shape
    Lp = L - 2                  # AvgPool1d(3, stride=1), no padding
    Lout = Lp - (K - 1)         # Conv1d(kernel=K, stride=1), 'VALID'
    Lout_pad = o_ref.shape[-1]

    pw = pw_ref[...]
    w1 = w1_ref[...]
    w2e_base = _NSCALAR_COLS            # conv2 weights, even (yi-derived) out channels
    w2o_base = _NSCALAR_COLS + 2 * K    # conv2 weights, odd  (yr-derived) out channels

    def pcol(j):                        # packed column j -> (1, C, 1) per-channel vector
        return pw[:, j][None, :, None]

    # ---- GCU activation: sin/cos evaluated exactly once on the raw C channels (EUP) ----
    yi = x * jnp.sin(x)
    yr = x * jnp.cos(x)

    # ---- BN1 batch statistics (training mode, biased variance), one reduce pass each ---
    def bn_stats(y):
        mu = jnp.mean(y, axis=(0, 2), keepdims=True)
        msq = jnp.mean(y * y, axis=(0, 2), keepdims=True)
        var = jnp.maximum(msq - mu * mu, 0.0)
        return mu, jax.lax.rsqrt(var + EPS)

    mu_i, inv_i = bn_stats(yi)
    mu_r, inv_r = bn_stats(yr)

    # ---- AvgPool1d(3, 1) on the RAW activation (pooling commutes with any per-channel
    #      affine, so BN1 normalize+affine is folded into the per-consumer FMAs below). --
    def pool3(y):
        return (y[:, :, 0:Lp] + y[:, :, 1:Lp + 1] + y[:, :, 2:Lp + 2]) * (1.0 / 3.0)

    pi = pool3(yi)                      # (B, C, Lp)
    pr = pool3(yr)

    def bn1_affine(p, mu, inv, gcol, bcol):   # single FMA: p*s + (b - mu*s)
        s = pcol(gcol) * inv
        return p * s + (pcol(bcol) - mu * s)

    u1a = bn1_affine(pi, mu_i, inv_i, G1_1A, B1_1A)   # conv1 group 0 input (yi half)
    u1b = bn1_affine(pr, mu_r, inv_r, G1_1B, B1_1B)   # conv1 group 1 input (yr half)
    u2e = bn1_affine(pi, mu_i, inv_i, G1_2E, B1_2E)   # conv2 even channels (yi-derived)
    u2o = bn1_affine(pr, mu_r, inv_r, G1_2O, B1_2O)   # conv2 odd  channels (yr-derived)

    # NOTE: the Conv1d biases are dropped entirely — a per-channel bias that immediately
    # feeds a training-mode BatchNorm cancels exactly ((z+b) - mean(z+b) == z - mean(z)).

    def taps_of(u):                     # K lane-shifted views, hoisted & shared
        return [u[:, :, k:k + Lout] for k in range(K)]

    # ---- conv1: Conv1d(2C -> 2C, kernel=K, groups=2, stride=1, 'VALID') ----------------
    def conv1_group(u, wcols):
        # u: (B, C, Lp) group input; wcols: (C, K*C), column k*C+i holds w[:, i, k].
        taps = taps_of(u)
        if use_mxu:
            # im2col: ONE bf16 batched MXU contraction of depth K*C, f32 accumulate.
            U = jnp.concatenate(taps, axis=1).astype(jnp.bfloat16)      # (B, K*C, Lout)
            Wb = jnp.broadcast_to(wcols.astype(jnp.bfloat16)[None, :, :],
                                  (B, C, K * C))
            return jnp.einsum('boj,bjl->bol', Wb, U,
                              preferred_element_type=jnp.float32)
        # Small C: VPU broadcast-FMAs on the hoisted taps (a K*C-deep matmul would run
        # the MXU at <1% utilization at these sizes).
        acc = jnp.zeros((B, C, Lout), jnp.float32)
        for k in range(K):
            tk = taps[k]
            for i in range(C):
                acc = acc + wcols[:, k * C + i][None, :, None] * tk[:, i:i + 1, :]
        return acc

    KC = K * C
    z1a = conv1_group(u1a, w1[:, :KC])
    z1b = conv1_group(u1b, w1[:, KC:])

    # ---- conv2: Conv1d(2C -> 2C, kernel=K, groups=C): a 2x2xK stencil per group --------
    #      Taps computed once and shared by the even- and odd-channel outputs (VPU FMAs).
    te = taps_of(u2e)
    to = taps_of(u2o)

    def conv2_out(base):
        acc = jnp.zeros((B, C, Lout), jnp.float32)
        for k in range(K):
            acc = acc + pcol(base + k) * te[k] + pcol(base + K + k) * to[k]
        return acc

    z2e = conv2_out(w2e_base)
    z2o = conv2_out(w2o_base)

    # ---- BN2 (training mode), folded into a single per-channel FMA ---------------------
    def bn2(z, gcol, bcol):
        mu = jnp.mean(z, axis=(0, 2), keepdims=True)
        msq = jnp.mean(z * z, axis=(0, 2), keepdims=True)
        var = jnp.maximum(msq - mu * mu, 0.0)
        s = jax.lax.rsqrt(var + EPS) * pcol(gcol)
        return z * s + (pcol(bcol) - mu * s)

    y1a = bn2(z1a, G2_1A, B2_1A)
    y1b = bn2(z1b, G2_1B, B2_1B)
    y2e = bn2(z2e, G2_2E, B2_2E)
    y2o = bn2(z2o, G2_2O, B2_2O)

    # ---- lane-dense stores: 4 contiguous (B, C, Lout_pad) slab stores -------------------
    # Branch 2's PyTorch channel interleave is restored in the wrapper (layout plumbing,
    # fused by XLA into the slice that removes the lane padding).
    lane_pad = Lout_pad - Lout
    zpad = jnp.zeros((B, C, lane_pad), jnp.float32) if lane_pad > 0 else None

    def store(q, y):
        if zpad is not None:
            y = jnp.concatenate([y, zpad], axis=-1)
        o_ref[:, q * C:(q + 1) * C, :] = y.astype(o_ref.dtype)

    store(0, y1a)
    store(1, y1b)
    store(2, y2e)
    store(3, y2o)


# ----------------------------------------------------------------------------
# Host-side parameter packing (pure, cheap reshuffling of the nn.Module weights)
# ----------------------------------------------------------------------------
def _pack_params(C, K, params1, params2):
    g1_1, b1_1, w1, cb1, g2_1, b2_1 = params1          # conv1 branch (groups=2)
    g1_2, b1_2, w2, cb2, g2_2, b2_2 = params2          # conv2 branch (groups=C)
    del cb1, cb2   # conv biases cancel exactly under the following training-mode BN2

    def halves(v):                                      # (2C,1) -> yi half, yr half
        v = v.reshape(2 * C)
        return v[:C], v[C:]

    def parities(v):                                    # (2C,1) -> even, odd channels
        v = v.reshape(2 * C)
        return v[0::2], v[1::2]

    cols = []
    for v in (g1_1, b1_1, g2_1, b2_1):
        a, b = halves(v)
        cols += [a, b]
    for v in (g1_2, b1_2, g2_2, b2_2):
        e, o = parities(v)
        cols += [e, o]

    pw = jnp.concatenate(
        [jnp.stack(cols, axis=1),                       # (C, 16) BN affine params
         w2[0::2].reshape(C, 2 * K),                    # conv2 weights, even out channels
         w2[1::2].reshape(C, 2 * K)],                   # conv2 weights, odd  out channels
        axis=1).astype(jnp.float32)                     # (C, 16 + 4K)

    def grp(w):                                         # (C, C, K) -> (C, K*C), tap-major
        return jnp.transpose(w, (0, 2, 1)).reshape(C, K * C)

    w1p = jnp.concatenate([grp(w1[:C]), grp(w1[C:])],   # conv1 groups 0 and 1
                          axis=1).astype(jnp.float32)   # (C, 2*K*C)
    return pw, w1p


@functools.partial(jax.jit, static_argnames=("kernel",))
def gcu_forward(x, params1, params2, *, kernel=3):
    """Fused GCU.forward (stride=1): both branches in one pallas_call."""
    B, C, L = x.shape
    K = kernel
    Lout = L - 2 - (K - 1)
    Lout_pad = ((Lout + 127) // 128) * 128      # lane-dense (unmasked) output stores
    pw, w1p = _pack_params(C, K, params1, params2)
    use_mxu = C >= 16                           # im2col MXU path once K*C contraction pays

    # TODO(synk): for B*C*L beyond a few MiB, switch to an L-tiled pipelined grid with a
    # multi-pass BatchNorm (stats pass + normalize/pool/conv pass + BN2 pass), halo'd
    # input blocks, and a "parallel" axis for v7x megacore; at the module's shapes the
    # whole problem fits in one VMEM-resident block.
    slab = 4 * B * C * max(L, Lout_pad)                         # one f32 working slab
    est = (40 * slab + 8 * B * 4 * C * Lout_pad
           + 4 * (pw.size + w1p.size) + x.size * x.dtype.itemsize)
    vmem_limit = int(min(max(est, 16 * 2 ** 20), 64 * 2 ** 20))  # <= v7x physical VMEM

    kfn = functools.partial(_gcu_fused_kernel, K=K, use_mxu=use_mxu)
    vmem = pl.BlockSpec(memory_space=pltpu.MemorySpace.VMEM)
    raw = pl.pallas_call(
        kfn,
        out_shape=jax.ShapeDtypeStruct((B, 4 * C, Lout_pad), jnp.float32),
        in_specs=[vmem, vmem, vmem],
        out_specs=vmem,
        compiler_params=pltpu.CompilerParams(vmem_limit_bytes=vmem_limit),
    )(x, pw, w1p)        # input DMA'd in its native dtype; cast to f32 inside the kernel

    # Un-pad and restore branch 2's PyTorch channel interleave (fused into one XLA copy).
    raw = raw[:, :, :Lout]
    y1 = raw[:, :2 * C]
    y2 = jnp.stack([raw[:, 2 * C:3 * C], raw[:, 3 * C:]], axis=2).reshape(B, 2 * C, Lout)
    return jnp.concatenate([y1, y2], axis=1)


# ----------------------------------------------------------------------------
# Deterministic parameter init (synthetic; shapes follow the nn.Module __init__)
# ----------------------------------------------------------------------------
def init_branch(key, C2, groups, kernel=3):
    ks = jax.random.split(key, 6)
    cin = C2 // groups
    g1 = 1.0 + 0.1 * jax.random.normal(ks[0], (C2, 1), jnp.float32)
    b1 = 0.1 * jax.random.normal(ks[1], (C2, 1), jnp.float32)
    w = 0.5 * jax.random.normal(ks[2], (C2, cin, kernel), jnp.float32)
    cb = 0.1 * jax.random.normal(ks[3], (C2, 1), jnp.float32)
    g2 = 1.0 + 0.1 * jax.random.normal(ks[4], (C2, 1), jnp.float32)
    b2 = 0.1 * jax.random.normal(ks[5], (C2, 1), jnp.float32)
    return (g1, b1, w, cb, g2, b2)


# ----------------------------------------------------------------------------
# Pure-JAX reference mirroring the PyTorch forward (for correctness check)
# ----------------------------------------------------------------------------
def torch_like_reference(x, params1, params2):
    b, c, l = x.shape
    yi = x * jnp.sin(x)
    yr = x * jnp.cos(x)
    y1 = jnp.concatenate([yi, yr], axis=1)
    y2 = jnp.concatenate([yi, yr], axis=-1).reshape(b, 2 * c, -1)

    def seq(y, params, groups):
        g1, b1, w, cb, g2, b2 = params
        mu = y.mean(axis=(0, 2), keepdims=True)
        var = ((y - mu) ** 2).mean(axis=(0, 2), keepdims=True)
        y = (y - mu) / jnp.sqrt(var + EPS) * g1[None] + b1[None]
        y = (y[:, :, :-2] + y[:, :, 1:-1] + y[:, :, 2:]) / 3.0
        y = jax.lax.conv_general_dilated(
            y, w, window_strides=(1,), padding='VALID',
            dimension_numbers=('NCH', 'OIH', 'NCH'),
            feature_group_count=groups) + cb[None]
        mu2 = y.mean(axis=(0, 2), keepdims=True)
        var2 = ((y - mu2) ** 2).mean(axis=(0, 2), keepdims=True)
        return (y - mu2) / jnp.sqrt(var2 + EPS) * g2[None] + b2[None]

    return jnp.concatenate([seq(y1, params1, 2), seq(y2, params2, c)], axis=1)


if __name__ == "__main__":
    key = jax.random.PRNGKey(0)

    # --- small shape (C=4): exercises the VPU conv1 path, tight f32 tolerance -----------
    kx, k1, k2 = jax.random.split(key, 3)
    B, C, L = 2, 4, 16                          # x: (batch, channels, length)
    x = jax.random.normal(kx, (B, C, L), jnp.float32)
    params1 = init_branch(k1, 2 * C, groups=2)  # conv1 branch: w (2C, C, 3)
    params2 = init_branch(k2, 2 * C, groups=C)  # conv2 branch: w (2C, 2, 3)
    out = jax.block_until_ready(gcu_forward(x, params1, params2))   # (2, 16, 12)
    ref = torch_like_reference(x, params1, params2)
    np.testing.assert_allclose(np.asarray(out), np.asarray(ref), rtol=2e-4, atol=2e-4)

    # --- larger channel count (C=16): exercises the bf16 im2col MXU conv1 path ----------
    # (tolerance loosened for bf16 matmul operands with f32 accumulation)
    kx2, k3, k4 = jax.random.split(jax.random.PRNGKey(1), 3)
    Bb, Cb, Lb = 2, 16, 40
    x2 = jax.random.normal(kx2, (Bb, Cb, Lb), jnp.float32)
    p1b = init_branch(k3, 2 * Cb, groups=2)
    p2b = init_branch(k4, 2 * Cb, groups=Cb)
    out2 = jax.block_until_ready(gcu_forward(x2, p1b, p2b))          # (2, 64, 36)
    ref2 = torch_like_reference(x2, p1b, p2b)
    np.testing.assert_allclose(np.asarray(out2), np.asarray(ref2), rtol=5e-2, atol=5e-2)

    print("KERNEL_OK")
</pallas_src>

<mosaic_0001>
module attributes {stable_mosaic.version = 11 : i64} {
  func.func @_gcu_fused_kernel(%arg0: memref<2x4x16xf32, #tpu.memory_space<vmem>>, %arg1: memref<4x28xf32, #tpu.memory_space<vmem>>, %arg2: memref<4x24xf32, #tpu.memory_space<vmem>>, %arg3: memref<2x16x128xf32, #tpu.memory_space<vmem>>) attributes {dimension_semantics = [], scalar_prefetch = 0 : i64, scratch_operands = 0 : i64, tpu.core_type = #tpu.core_type<tc>} {
    %c0 = arith.constant 0 : index
    %c0_0 = arith.constant 0 : index
    %c0_1 = arith.constant 0 : index
    %0 = vector.load %arg0[%c0, %c0_0, %c0_1] : memref<2x4x16xf32, #tpu.memory_space<vmem>>, vector<2x4x16xf32>
    %c0_2 = arith.constant 0 : index
    %c0_3 = arith.constant 0 : index
    %1 = vector.load %arg1[%c0_2, %c0_3] : memref<4x28xf32, #tpu.memory_space<vmem>>, vector<4x28xf32>
    %c0_4 = arith.constant 0 : index
    %c0_5 = arith.constant 0 : index
    %2 = vector.load %arg2[%c0_4, %c0_5] : memref<4x24xf32, #tpu.memory_space<vmem>>, vector<4x24xf32>
    %3 = math.sin %0 : vector<2x4x16xf32>
    %4 = arith.mulf %0, %3 : vector<2x4x16xf32>
    %5 = math.cos %0 : vector<2x4x16xf32>
    %6 = arith.mulf %0, %5 : vector<2x4x16xf32>
    %cst = arith.constant dense<0.000000e+00> : vector<4xf32>
    %7 = vector.multi_reduction <add>, %4, %cst [0, 2] : vector<2x4x16xf32> to vector<4xf32>
    %8 = vector.shape_cast %7 : vector<4xf32> to vector<1x4x1xf32>
    %cst_6 = arith.constant 3.200000e+01 : f32
    %9 = vector.broadcast %cst_6 : f32 to vector<1x4x1xf32>
    %10 = arith.divf %8, %9 : vector<1x4x1xf32>
    %11 = arith.mulf %4, %4 : vector<2x4x16xf32>
    %cst_7 = arith.constant dense<0.000000e+00> : vector<4xf32>
    %12 = vector.multi_reduction <add>, %11, %cst_7 [0, 2] : vector<2x4x16xf32> to vector<4xf32>
    %13 = vector.shape_cast %12 : vector<4xf32> to vector<1x4x1xf32>
    %cst_8 = arith.constant 3.200000e+01 : f32
    %14 = vector.broadcast %cst_8 : f32 to vector<1x4x1xf32>
    %15 = arith.divf %13, %14 : vector<1x4x1xf32>
    %16 = arith.mulf %10, %10 : vector<1x4x1xf32>
    %17 = arith.subf %15, %16 : vector<1x4x1xf32>
    %cst_9 = arith.constant 0.000000e+00 : f32
    %18 = vector.broadcast %cst_9 : f32 to vector<1x4x1xf32>
    %19 = arith.maximumf %17, %18 : vector<1x4x1xf32>
    %cst_10 = arith.constant 9.99999974E-6 : f32
    %20 = vector.broadcast %cst_10 : f32 to vector<1x4x1xf32>
    %21 = arith.addf %19, %20 : vector<1x4x1xf32>
    %22 = math.rsqrt %21 : vector<1x4x1xf32>
    %cst_11 = arith.constant dense<0.000000e+00> : vector<4xf32>
    %23 = vector.multi_reduction <add>, %6, %cst_11 [0, 2] : vector<2x4x16xf32> to vector<4xf32>
    %24 = vector.shape_cast %23 : vector<4xf32> to vector<1x4x1xf32>
    %cst_12 = arith.constant 3.200000e+01 : f32
    %25 = vector.broadcast %cst_12 : f32 to vector<1x4x1xf32>
    %26 = arith.divf %24, %25 : vector<1x4x1xf32>
    %27 = arith.mulf %6, %6 : vector<2x4x16xf32>
    %cst_13 = arith.constant dense<0.000000e+00> : vector<4xf32>
    %28 = vector.multi_reduction <add>, %27, %cst_13 [0, 2] : vector<2x4x16xf32> to vector<4xf32>
    %29 = vector.shape_cast %28 : vector<4xf32> to vector<1x4x1xf32>
    %cst_14 = arith.constant 3.200000e+01 : f32
    %30 = vector.broadcast %cst_14 : f32 to vector<1x4x1xf32>
    %31 = arith.divf %29, %30 : vector<1x4x1xf32>
    %32 = arith.mulf %26, %26 : vector<1x4x1xf32>
    %33 = arith.subf %31, %32 : vector<1x4x1xf32>
    %cst_15 = arith.constant 0.000000e+00 : f32
    %34 = vector.broadcast %cst_15 : f32 to vector<1x4x1xf32>
    %35 = arith.maximumf %33, %34 : vector<1x4x1xf32>
    %cst_16 = arith.constant 9.99999974E-6 : f32
    %36 = vector.broadcast %cst_16 : f32 to vector<1x4x1xf32>
    %37 = arith.addf %35, %36 : vector<1x4x1xf32>
    %38 = math.rsqrt %37 : vector<1x4x1xf32>
    %39 = vector.extract_strided_slice %4 {offsets = [0, 0, 0], sizes = [2, 4, 14], strides = [1, 1, 1]} : vector<2x4x16xf32> to vector<2x4x14xf32>
    %40 = vector.extract_strided_slice %4 {offsets = [0, 0, 1], sizes = [2, 4, 14], strides = [1, 1, 1]} : vector<2x4x16xf32> to vector<2x4x14xf32>
    %41 = arith.addf %39, %40 : vector<2x4x14xf32>
    %42 = vector.extract_strided_slice %4 {offsets = [0, 0, 2], sizes = [2, 4, 14], strides = [1, 1, 1]} : vector<2x4x16xf32> to vector<2x4x14xf32>
    %43 = arith.addf %41, %42 : vector<2x4x14xf32>
    %cst_17 = arith.constant 0.333333343 : f32
    %44 = vector.broadcast %cst_17 : f32 to vector<2x4x14xf32>
    %45 = arith.mulf %43, %44 : vector<2x4x14xf32>
    %46 = vector.extract_strided_slice %6 {offsets = [0, 0, 0], sizes = [2, 4, 14], strides = [1, 1, 1]} : vector<2x4x16xf32> to vector<2x4x14xf32>
    %47 = vector.extract_strided_slice %6 {offsets = [0, 0, 1], sizes = [2, 4, 14], strides = [1, 1, 1]} : vector<2x4x16xf32> to vector<2x4x14xf32>
    %48 = arith.addf %46, %47 : vector<2x4x14xf32>
    %49 = vector.extract_strided_slice %6 {offsets = [0, 0, 2], sizes = [2, 4, 14], strides = [1, 1, 1]} : vector<2x4x16xf32> to vector<2x4x14xf32>
    %50 = arith.addf %48, %49 : vector<2x4x14xf32>
    %cst_18 = arith.constant 0.333333343 : f32
    %51 = vector.broadcast %cst_18 : f32 to vector<2x4x14xf32>
    %52 = arith.mulf %50, %51 : vector<2x4x14xf32>
    %53 = vector.extract_strided_slice %1 {offsets = [0, 0], sizes = [4, 1], strides = [1, 1]} : vector<4x28xf32> to vector<4x1xf32>
    %54 = vector.shape_cast %53 : vector<4x1xf32> to vector<4xf32>
    %55 = vector.shape_cast %54 : vector<4xf32> to vector<1x4x1xf32>
    %56 = arith.mulf %55, %22 : vector<1x4x1xf32>
    %57 = vector.broadcast %56 : vector<1x4x1xf32> to vector<2x4x14xf32>
    %58 = arith.mulf %45, %57 : vector<2x4x14xf32>
    %59 = vector.extract_strided_slice %1 {offsets = [0, 2], sizes = [4, 1], strides = [1, 1]} : vector<4x28xf32> to vector<4x1xf32>
    %60 = vector.shape_cast %59 : vector<4x1xf32> to vector<4xf32>
    %61 = vector.shape_cast %60 : vector<4xf32> to vector<1x4x1xf32>
    %62 = arith.mulf %10, %56 : vector<1x4x1xf32>
    %63 = arith.subf %61, %62 : vector<1x4x1xf32>
    %64 = vector.broadcast %63 : vector<1x4x1xf32> to vector<2x4x14xf32>
    %65 = arith.addf %58, %64 : vector<2x4x14xf32>
    %66 = vector.extract_strided_slice %1 {offsets = [0, 1], sizes = [4, 1], strides = [1, 1]} : vector<4x28xf32> to vector<4x1xf32>
    %67 = vector.shape_cast %66 : vector<4x1xf32> to vector<4xf32>
    %68 = vector.shape_cast %67 : vector<4xf32> to vector<1x4x1xf32>
    %69 = arith.mulf %68, %38 : vector<1x4x1xf32>
    %70 = vector.broadcast %69 : vector<1x4x1xf32> to vector<2x4x14xf32>
    %71 = arith.mulf %52, %70 : vector<2x4x14xf32>
    %72 = vector.extract_strided_slice %1 {offsets = [0, 3], sizes = [4, 1], strides = [1, 1]} : vector<4x28xf32> to vector<4x1xf32>
    %73 = vector.shape_cast %72 : vector<4x1xf32> to vector<4xf32>
    %74 = vector.shape_cast %73 : vector<4xf32> to vector<1x4x1xf32>
    %75 = arith.mulf %26, %69 : vector<1x4x1xf32>
    %76 = arith.subf %74, %75 : vector<1x4x1xf32>
    %77 = vector.broadcast %76 : vector<1x4x1xf32> to vector<2x4x14xf32>
    %78 = arith.addf %71, %77 : vector<2x4x14xf32>
    %79 = vector.extract_strided_slice %1 {offsets = [0, 8], sizes = [4, 1], strides = [1, 1]} : vector<4x28xf32> to vector<4x1xf32>
    %80 = vector.shape_cast %79 : vector<4x1xf32> to vector<4xf32>
    %81 = vector.shape_cast %80 : vector<4xf32> to vector<1x4x1xf32>
    %82 = arith.mulf %81, %22 : vector<1x4x1xf32>
    %83 = vector.broadcast %82 : vector<1x4x1xf32> to vector<2x4x14xf32>
    %84 = arith.mulf %45, %83 : vector<2x4x14xf32>
    %85 = vector.extract_strided_slice %1 {offsets = [0, 10], sizes = [4, 1], strides = [1, 1]} : vector<4x28xf32> to vector<4x1xf32>
    %86 = vector.shape_cast %85 : vector<4x1xf32> to vector<4xf32>
    %87 = vector.shape_cast %86 : vector<4xf32> to vector<1x4x1xf32>
    %88 = arith.mulf %10, %82 : vector<1x4x1xf32>
    %89 = arith.subf %87, %88 : vector<1x4x1xf32>
    %90 = vector.broadcast %89 : vector<1x4x1xf32> to vector<2x4x14xf32>
    %91 = arith.addf %84, %90 : vector<2x4x14xf32>
    %92 = vector.extract_strided_slice %1 {offsets = [0, 9], sizes = [4, 1], strides = [1, 1]} : vector<4x28xf32> to vector<4x1xf32>
    %93 = vector.shape_cast %92 : vector<4x1xf32> to vector<4xf32>
    %94 = vector.shape_cast %93 : vector<4xf32> to vector<1x4x1xf32>
    %95 = arith.mulf %94, %38 : vector<1x4x1xf32>
    %96 = vector.broadcast %95 : vector<1x4x1xf32> to vector<2x4x14xf32>
    %97 = arith.mulf %52, %96 : vector<2x4x14xf32>
    %98 = vector.extract_strided_slice %1 {offsets = [0, 11], sizes = [4, 1], strides = [1, 1]} : vector<4x28xf32> to vector<4x1xf32>
    %99 = vector.shape_cast %98 : vector<4x1xf32> to vector<4xf32>
    %100 = vector.shape_cast %99 : vector<4xf32> to vector<1x4x1xf32>
    %101 = arith.mulf %26, %95 : vector<1x4x1xf32>
    %102 = arith.subf %100, %101 : vector<1x4x1xf32>
    %103 = vector.broadcast %102 : vector<1x4x1xf32> to vector<2x4x14xf32>
    %104 = arith.addf %97, %103 : vector<2x4x14xf32>
    %105 = vector.extract_strided_slice %2 {offsets = [0, 0], sizes = [4, 12], strides = [1, 1]} : vector<4x24xf32> to vector<4x12xf32>
    %106 = vector.extract_strided_slice %65 {offsets = [0, 0, 0], sizes = [2, 4, 12], strides = [1, 1, 1]} : vector<2x4x14xf32> to vector<2x4x12xf32>
    %107 = vector.extract_strided_slice %65 {offsets = [0, 0, 1], sizes = [2, 4, 12], strides = [1, 1, 1]} : vector<2x4x14xf32> to vector<2x4x12xf32>
    %108 = vector.extract_strided_slice %65 {offsets = [0, 0, 2], sizes = [2, 4, 12], strides = [1, 1, 1]} : vector<2x4x14xf32> to vector<2x4x12xf32>
    %cst_19 = arith.constant 0.000000e+00 : f32
    %109 = vector.broadcast %cst_19 : f32 to vector<2x4x12xf32>
    %110 = vector.extract_strided_slice %105 {offsets = [0, 0], sizes = [4, 1], strides = [1, 1]} : vector<4x12xf32> to vector<4x1xf32>
    %111 = vector.shape_cast %110 : vector<4x1xf32> to vector<4xf32>
    %112 = vector.shape_cast %111 : vector<4xf32> to vector<1x4x1xf32>
    %113 = vector.extract_strided_slice %106 {offsets = [0, 0, 0], sizes = [2, 1, 12], strides = [1, 1, 1]} : vector<2x4x12xf32> to vector<2x1x12xf32>
    %114 = vector.broadcast %112 : vector<1x4x1xf32> to vector<2x4x12xf32>
    %115 = vector.broadcast %113 : vector<2x1x12xf32> to vector<2x4x12xf32>
    %116 = arith.mulf %114, %115 : vector<2x4x12xf32>
    %117 = arith.addf %109, %116 : vector<2x4x12xf32>
    %118 = vector.extract_strided_slice %105 {offsets = [0, 1], sizes = [4, 1], strides = [1, 1]} : vector<4x12xf32> to vector<4x1xf32>
    %119 = vector.shape_cast %118 : vector<4x1xf32> to vector<4xf32>
    %120 = vector.shape_cast %119 : vector<4xf32> to vector<1x4x1xf32>
    %121 = vector.extract_strided_slice %106 {offsets = [0, 1, 0], sizes = [2, 1, 12], strides = [1, 1, 1]} : vector<2x4x12xf32> to vector<2x1x12xf32>
    %122 = vector.broadcast %120 : vector<1x4x1xf32> to vector<2x4x12xf32>
    %123 = vector.broadcast %121 : vector<2x1x12xf32> to vector<2x4x12xf32>
    %124 = arith.mulf %122, %123 : vector<2x4x12xf32>
    %125 = arith.addf %117, %124 : vector<2x4x12xf32>
    %126 = vector.extract_strided_slice %105 {offsets = [0, 2], sizes = [4, 1], strides = [1, 1]} : vector<4x12xf32> to vector<4x1xf32>
    %127 = vector.shape_cast %126 : vector<4x1xf32> to vector<4xf32>
    %128 = vector.shape_cast %127 : vector<4xf32> to vector<1x4x1xf32>
    %129 = vector.extract_strided_slice %106 {offsets = [0, 2, 0], sizes = [2, 1, 12], strides = [1, 1, 1]} : vector<2x4x12xf32> to vector<2x1x12xf32>
    %130 = vector.broadcast %128 : vector<1x4x1xf32> to vector<2x4x12xf32>
    %131 = vector.broadcast %129 : vector<2x1x12xf32> to vector<2x4x12xf32>
    %132 = arith.mulf %130, %131 : vector<2x4x12xf32>
    %133 = arith.addf %125, %132 : vector<2x4x12xf32>
    %134 = vector.extract_strided_slice %105 {offsets = [0, 3], sizes = [4, 1], strides = [1, 1]} : vector<4x12xf32> to vector<4x1xf32>
    %135 = vector.shape_cast %134 : vector<4x1xf32> to vector<4xf32>
    %136 = vector.shape_cast %135 : vector<4xf32> to vector<1x4x1xf32>
    %137 = vector.extract_strided_slice %106 {offsets = [0, 3, 0], sizes = [2, 1, 12], strides = [1, 1, 1]} : vector<2x4x12xf32> to vector<2x1x12xf32>
    %138 = vector.broadcast %136 : vector<1x4x1xf32> to vector<2x4x12xf32>
    %139 = vector.broadcast %137 : vector<2x1x12xf32> to vector<2x4x12xf32>
    %140 = arith.mulf %138, %139 : vector<2x4x12xf32>
    %141 = arith.addf %133, %140 : vector<2x4x12xf32>
    %142 = vector.extract_strided_slice %105 {offsets = [0, 4], sizes = [4, 1], strides = [1, 1]} : vector<4x12xf32> to vector<4x1xf32>
    %143 = vector.shape_cast %142 : vector<4x1xf32> to vector<4xf32>
    %144 = vector.shape_cast %143 : vector<4xf32> to vector<1x4x1xf32>
    %145 = vector.extract_strided_slice %107 {offsets = [0, 0, 0], sizes = [2, 1, 12], strides = [1, 1, 1]} : vector<2x4x12xf32> to vector<2x1x12xf32>
    %146 = vector.broadcast %144 : vector<1x4x1xf32> to vector<2x4x12xf32>
    %147 = vector.broadcast %145 : vector<2x1x12xf32> to vector<2x4x12xf32>
    %148 = arith.mulf %146, %147 : vector<2x4x12xf32>
    %149 = arith.addf %141, %148 : vector<2x4x12xf32>
    %150 = vector.extract_strided_slice %105 {offsets = [0, 5], sizes = [4, 1], strides = [1, 1]} : vector<4x12xf32> to vector<4x1xf32>
    %151 = vector.shape_cast %150 : vector<4x1xf32> to vector<4xf32>
    %152 = vector.shape_cast %151 : vector<4xf32> to vector<1x4x1xf32>
    %153 = vector.extract_strided_slice %107 {offsets = [0, 1, 0], sizes = [2, 1, 12], strides = [1, 1, 1]} : vector<2x4x12xf32> to vector<2x1x12xf32>
    %154 = vector.broadcast %152 : vector<1x4x1xf32> to vector<2x4x12xf32>
    %155 = vector.broadcast %153 : vector<2x1x12xf32> to vector<2x4x12xf32>
    %156 = arith.mulf %154, %155 : vector<2x4x12xf32>
    %157 = arith.addf %149, %156 : vector<2x4x12xf32>
    %158 = vector.extract_strided_slice %105 {offsets = [0, 6], sizes = [4, 1], strides = [1, 1]} : vector<4x12xf32> to vector<4x1xf32>
    %159 = vector.shape_cast %158 : vector<4x1xf32> to vector<4xf32>
    %160 = vector.shape_cast %159 : vector<4xf32> to vector<1x4x1xf32>
    %161 = vector.extract_strided_slice %107 {offsets = [0, 2, 0], sizes = [2, 1, 12], strides = [1, 1, 1]} : vector<2x4x12xf32> to vector<2x1x12xf32>
    %162 = vector.broadcast %160 : vector<1x4x1xf32> to vector<2x4x12xf32>
    %163 = vector.broadcast %161 : vector<2x1x12xf32> to vector<2x4x12xf32>
    %164 = arith.mulf %162, %163 : vector<2x4x12xf32>
    %165 = arith.addf %157, %164 : vector<2x4x12xf32>
    %166 = vector.extract_strided_slice %105 {offsets = [0, 7], sizes = [4, 1], strides = [1, 1]} : vector<4x12xf32> to vector<4x1xf32>
    %167 = vector.shape_cast %166 : vector<4x1xf32> to vector<4xf32>
    %168 = vector.shape_cast %167 : vector<4xf32> to vector<1x4x1xf32>
    %169 = vector.extract_strided_slice %107 {offsets = [0, 3, 0], sizes = [2, 1, 12], strides = [1, 1, 1]} : vector<2x4x12xf32> to vector<2x1x12xf32>
    %170 = vector.broadcast %168 : vector<1x4x1xf32> to vector<2x4x12xf32>
    %171 = vector.broadcast %169 : vector<2x1x12xf32> to vector<2x4x12xf32>
    %172 = arith.mulf %170, %171 : vector<2x4x12xf32>
    %173 = arith.addf %165, %172 : vector<2x4x12xf32>
    %174 = vector.extract_strided_slice %105 {offsets = [0, 8], sizes = [4, 1], strides = [1, 1]} : vector<4x12xf32> to vector<4x1xf32>
    %175 = vector.shape_cast %174 : vector<4x1xf32> to vector<4xf32>
    %176 = vector.shape_cast %175 : vector<4xf32> to vector<1x4x1xf32>
    %177 = vector.extract_strided_slice %108 {offsets = [0, 0, 0], sizes = [2, 1, 12], strides = [1, 1, 1]} : vector<2x4x12xf32> to vector<2x1x12xf32>
    %178 = vector.broadcast %176 : vector<1x4x1xf32> to vector<2x4x12xf32>
    %179 = vector.broadcast %177 : vector<2x1x12xf32> to vector<2x4x12xf32>
    %180 = arith.mulf %178, %179 : vector<2x4x12xf32>
    %181 = arith.addf %173, %180 : vector<2x4x12xf32>
    %182 = vector.extract_strided_slice %105 {offsets = [0, 9], sizes = [4, 1], strides = [1, 1]} : vector<4x12xf32> to vector<4x1xf32>
    %183 = vector.shape_cast %182 : vector<4x1xf32> to vector<4xf32>
    %184 = vector.shape_cast %183 : vector<4xf32> to vector<1x4x1xf32>
    %185 = vector.extract_strided_slice %108 {offsets = [0, 1, 0], sizes = [2, 1, 12], strides = [1, 1, 1]} : vector<2x4x12xf32> to vector<2x1x12xf32>
    %186 = vector.broadcast %184 : vector<1x4x1xf32> to vector<2x4x12xf32>
    %187 = vector.broadcast %185 : vector<2x1x12xf32> to vector<2x4x12xf32>
    %188 = arith.mulf %186, %187 : vector<2x4x12xf32>
    %189 = arith.addf %181, %188 : vector<2x4x12xf32>
    %190 = vector.extract_strided_slice %105 {offsets = [0, 10], sizes = [4, 1], strides = [1, 1]} : vector<4x12xf32> to vector<4x1xf32>
    %191 = vector.shape_cast %190 : vector<4x1xf32> to vector<4xf32>
    %192 = vector.shape_cast %191 : vector<4xf32> to vector<1x4x1xf32>
    %193 = vector.extract_strided_slice %108 {offsets = [0, 2, 0], sizes = [2, 1, 12], strides = [1, 1, 1]} : vector<2x4x12xf32> to vector<2x1x12xf32>
    %194 = vector.broadcast %192 : vector<1x4x1xf32> to vector<2x4x12xf32>
    %195 = vector.broadcast %193 : vector<2x1x12xf32> to vector<2x4x12xf32>
    %196 = arith.mulf %194, %195 : vector<2x4x12xf32>
    %197 = arith.addf %189, %196 : vector<2x4x12xf32>
    %198 = vector.extract_strided_slice %105 {offsets = [0, 11], sizes = [4, 1], strides = [1, 1]} : vector<4x12xf32> to vector<4x1xf32>
    %199 = vector.shape_cast %198 : vector<4x1xf32> to vector<4xf32>
    %200 = vector.shape_cast %199 : vector<4xf32> to vector<1x4x1xf32>
    %201 = vector.extract_strided_slice %108 {offsets = [0, 3, 0], sizes = [2, 1, 12], strides = [1, 1, 1]} : vector<2x4x12xf32> to vector<2x1x12xf32>
    %202 = vector.broadcast %200 : vector<1x4x1xf32> to vector<2x4x12xf32>
    %203 = vector.broadcast %201 : vector<2x1x12xf32> to vector<2x4x12xf32>
    %204 = arith.mulf %202, %203 : vector<2x4x12xf32>
    %205 = arith.addf %197, %204 : vector<2x4x12xf32>
    %206 = vector.extract_strided_slice %2 {offsets = [0, 12], sizes = [4, 12], strides = [1, 1]} : vector<4x24xf32> to vector<4x12xf32>
    %207 = vector.extract_strided_slice %78 {offsets = [0, 0, 0], sizes = [2, 4, 12], strides = [1, 1, 1]} : vector<2x4x14xf32> to vector<2x4x12xf32>
    %208 = vector.extract_strided_slice %78 {offsets = [0, 0, 1], sizes = [2, 4, 12], strides = [1, 1, 1]} : vector<2x4x14xf32> to vector<2x4x12xf32>
    %209 = vector.extract_strided_slice %78 {offsets = [0, 0, 2], sizes = [2, 4, 12], strides = [1, 1, 1]} : vector<2x4x14xf32> to vector<2x4x12xf32>
    %cst_20 = arith.constant 0.000000e+00 : f32
    %210 = vector.broadcast %cst_20 : f32 to vector<2x4x12xf32>
    %211 = vector.extract_strided_slice %206 {offsets = [0, 0], sizes = [4, 1], strides = [1, 1]} : vector<4x12xf32> to vector<4x1xf32>
    %212 = vector.shape_cast %211 : vector<4x1xf32> to vector<4xf32>
    %213 = vector.shape_cast %212 : vector<4xf32> to vector<1x4x1xf32>
    %214 = vector.extract_strided_slice %207 {offsets = [0, 0, 0], sizes = [2, 1, 12], strides = [1, 1, 1]} : vector<2x4x12xf32> to vector<2x1x12xf32>
    %215 = vector.broadcast %213 : vector<1x4x1xf32> to vector<2x4x12xf32>
    %216 = vector.broadcast %214 : vector<2x1x12xf32> to vector<2x4x12xf32>
    %217 = arith.mulf %215, %216 : vector<2x4x12xf32>
    %218 = arith.addf %210, %217 : vector<2x4x12xf32>
    %219 = vector.extract_strided_slice %206 {offsets = [0, 1], sizes = [4, 1], strides = [1, 1]} : vector<4x12xf32> to vector<4x1xf32>
    %220 = vector.shape_cast %219 : vector<4x1xf32> to vector<4xf32>
    %221 = vector.shape_cast %220 : vector<4xf32> to vector<1x4x1xf32>
    %222 = vector.extract_strided_slice %207 {offsets = [0, 1, 0], sizes = [2, 1, 12], strides = [1, 1, 1]} : vector<2x4x12xf32> to vector<2x1x12xf32>
    %223 = vector.broadcast %221 : vector<1x4x1xf32> to vector<2x4x12xf32>
    %224 = vector.broadcast %222 : vector<2x1x12xf32> to vector<2x4x12xf32>
    %225 = arith.mulf %223, %224 : vector<2x4x12xf32>
    %226 = arith.addf %218, %225 : vector<2x4x12xf32>
    %227 = vector.extract_strided_slice %206 {offsets = [0, 2], sizes = [4, 1], strides = [1, 1]} : vector<4x12xf32> to vector<4x1xf32>
    %228 = vector.shape_cast %227 : vector<4x1xf32> to vector<4xf32>
    %229 = vector.shape_cast %228 : vector<4xf32> to vector<1x4x1xf32>
    %230 = vector.extract_strided_slice %207 {offsets = [0, 2, 0], sizes = [2, 1, 12], strides = [1, 1, 1]} : vector<2x4x12xf32> to vector<2x1x12xf32>
    %231 = vector.broadcast %229 : vector<1x4x1xf32> to vector<2x4x12xf32>
    %232 = vector.broadcast %230 : vector<2x1x12xf32> to vector<2x4x12xf32>
    %233 = arith.mulf %231, %232 : vector<2x4x12xf32>
    %234 = arith.addf %226, %233 : vector<2x4x12xf32>
    %235 = vector.extract_strided_slice %206 {offsets = [0, 3], sizes = [4, 1], strides = [1, 1]} : vector<4x12xf32> to vector<4x1xf32>
    %236 = vector.shape_cast %235 : vector<4x1xf32> to vector<4xf32>
    %237 = vector.shape_cast %236 : vector<4xf32> to vector<1x4x1xf32>
    %238 = vector.extract_strided_slice %207 {offsets = [0, 3, 0], sizes = [2, 1, 12], strides = [1, 1, 1]} : vector<2x4x12xf32> to vector<2x1x12xf32>
    %239 = vector.broadcast %237 : vector<1x4x1xf32> to vector<2x4x12xf32>
    %240 = vector.broadcast %238 : vector<2x1x12xf32> to vector<2x4x12xf32>
    %241 = arith.mulf %239, %240 : vector<2x4x12xf32>
    %242 = arith.addf %234, %241 : vector<2x4x12xf32>
    %243 = vector.extract_strided_slice %206 {offsets = [0, 4], sizes = [4, 1], strides = [1, 1]} : vector<4x12xf32> to vector<4x1xf32>
    %244 = vector.shape_cast %243 : vector<4x1xf32> to vector<4xf32>
    %245 = vector.shape_cast %244 : vector<4xf32> to vector<1x4x1xf32>
    %246 = vector.extract_strided_slice %208 {offsets = [0, 0, 0], sizes = [2, 1, 12], strides = [1, 1, 1]} : vector<2x4x12xf32> to vector<2x1x12xf32>
    %247 = vector.broadcast %245 : vector<1x4x1xf32> to vector<2x4x12xf32>
    %248 = vector.broadcast %246 : vector<2x1x12xf32> to vector<2x4x12xf32>
    %249 = arith.mulf %247, %248 : vector<2x4x12xf32>
    %250 = arith.addf %242, %249 : vector<2x4x12xf32>
    %251 = vector.extract_strided_slice %206 {offsets = [0, 5], sizes = [4, 1], strides = [1, 1]} : vector<4x12xf32> to vector<4x1xf32>
    %252 = vector.shape_cast %251 : vector<4x1xf32> to vector<4xf32>
    %253 = vector.shape_cast %252 : vector<4xf32> to vector<1x4x1xf32>
    %254 = vector.extract_strided_slice %208 {offsets = [0, 1, 0], sizes = [2, 1, 12], strides = [1, 1, 1]} : vector<2x4x12xf32> to vector<2x1x12xf32>
    %255 = vector.broadcast %253 : vector<1x4x1xf32> to vector<2x4x12xf32>
    %256 = vector.broadcast %254 : vector<2x1x12xf32> to vector<2x4x12xf32>
    %257 = arith.mulf %255, %256 : vector<2x4x12xf32>
    %258 = arith.addf %250, %257 : vector<2x4x12xf32>
    %259 = vector.extract_strided_slice %206 {offsets = [0, 6], sizes = [4, 1], strides = [1, 1]} : vector<4x12xf32> to vector<4x1xf32>
    %260 = vector.shape_cast %259 : vector<4x1xf32> to vector<4xf32>
    %261 = vector.shape_cast %260 : vector<4xf32> to vector<1x4x1xf32>
    %262 = vector.extract_strided_slice %208 {offsets = [0, 2, 0], sizes = [2, 1, 12], strides = [1, 1, 1]} : vector<2x4x12xf32> to vector<2x1x12xf32>
    %263 = vector.broadcast %261 : vector<1x4x1xf32> to vector<2x4x12xf32>
    %264 = vector.broadcast %262 : vector<2x1x12xf32> to vector<2x4x12xf32>
    %265 = arith.mulf %263, %264 : vector<2x4x12xf32>
    %266 = arith.addf %258, %265 : vector<2x4x12xf32>
    %267 = vector.extract_strided_slice %206 {offsets = [0, 7], sizes = [4, 1], strides = [1, 1]} : vector<4x12xf32> to vector<4x1xf32>
    %268 = vector.shape_cast %267 : vector<4x1xf32> to vector<4xf32>
    %269 = vector.shape_cast %268 : vector<4xf32> to vector<1x4x1xf32>
    %270 = vector.extract_strided_slice %208 {offsets = [0, 3, 0], sizes = [2, 1, 12], strides = [1, 1, 1]} : vector<2x4x12xf32> to vector<2x1x12xf32>
    %271 = vector.broadcast %269 : vector<1x4x1xf32> to vector<2x4x12xf32>
    %272 = vector.broadcast %270 : vector<2x1x12xf32> to vector<2x4x12xf32>
    %273 = arith.mulf %271, %272 : vector<2x4x12xf32>
    %274 = arith.addf %266, %273 : vector<2x4x12xf32>
    %275 = vector.extract_strided_slice %206 {offsets = [0, 8], sizes = [4, 1], strides = [1, 1]} : vector<4x12xf32> to vector<4x1xf32>
    %276 = vector.shape_cast %275 : vector<4x1xf32> to vector<4xf32>
    %277 = vector.shape_cast %276 : vector<4xf32> to vector<1x4x1xf32>
    %278 = vector.extract_strided_slice %209 {offsets = [0, 0, 0], sizes = [2, 1, 12], strides = [1, 1, 1]} : vector<2x4x12xf32> to vector<2x1x12xf32>
    %279 = vector.broadcast %277 : vector<1x4x1xf32> to vector<2x4x12xf32>
    %280 = vector.broadcast %278 : vector<2x1x12xf32> to vector<2x4x12xf32>
    %281 = arith.mulf %279, %280 : vector<2x4x12xf32>
    %282 = arith.addf %274, %281 : vector<2x4x12xf32>
    %283 = vector.extract_strided_slice %206 {offsets = [0, 9], sizes = [4, 1], strides = [1, 1]} : vector<4x12xf32> to vector<4x1xf32>
    %284 = vector.shape_cast %283 : vector<4x1xf32> to vector<4xf32>
    %285 = vector.shape_cast %284 : vector<4xf32> to vector<1x4x1xf32>
    %286 = vector.extract_strided_slice %209 {offsets = [0, 1, 0], sizes = [2, 1, 12], strides = [1, 1, 1]} : vector<2x4x12xf32> to vector<2x1x12xf32>
    %287 = vector.broadcast %285 : vector<1x4x1xf32> to vector<2x4x12xf32>
    %288 = vector.broadcast %286 : vector<2x1x12xf32> to vector<2x4x12xf32>
    %289 = arith.mulf %287, %288 : vector<2x4x12xf32>
    %290 = arith.addf %282, %289 : vector<2x4x12xf32>
    %291 = vector.extract_strided_slice %206 {offsets = [0, 10], sizes = [4, 1], strides = [1, 1]} : vector<4x12xf32> to vector<4x1xf32>
    %292 = vector.shape_cast %291 : vector<4x1xf32> to vector<4xf32>
    %293 = vector.shape_cast %292 : vector<4xf32> to vector<1x4x1xf32>
    %294 = vector.extract_strided_slice %209 {offsets = [0, 2, 0], sizes = [2, 1, 12], strides = [1, 1, 1]} : vector<2x4x12xf32> to vector<2x1x12xf32>
    %295 = vector.broadcast %293 : vector<1x4x1xf32> to vector<2x4x12xf32>
    %296 = vector.broadcast %294 : vector<2x1x12xf32> to vector<2x4x12xf32>
    %297 = arith.mulf %295, %296 : vector<2x4x12xf32>
    %298 = arith.addf %290, %297 : vector<2x4x12xf32>
    %299 = vector.extract_strided_slice %206 {offsets = [0, 11], sizes = [4, 1], strides = [1, 1]} : vector<4x12xf32> to vector<4x1xf32>
    %300 = vector.shape_cast %299 : vector<4x1xf32> to vector<4xf32>
    %301 = vector.shape_cast %300 : vector<4xf32> to vector<1x4x1xf32>
    %302 = vector.extract_strided_slice %209 {offsets = [0, 3, 0], sizes = [2, 1, 12], strides = [1, 1, 1]} : vector<2x4x12xf32> to vector<2x1x12xf32>
    %303 = vector.broadcast %301 : vector<1x4x1xf32> to vector<2x4x12xf32>
    %304 = vector.broadcast %302 : vector<2x1x12xf32> to vector<2x4x12xf32>
    %305 = arith.mulf %303, %304 : vector<2x4x12xf32>
    %306 = arith.addf %298, %305 : vector<2x4x12xf32>
    %307 = vector.extract_strided_slice %91 {offsets = [0, 0, 0], sizes = [2, 4, 12], strides = [1, 1, 1]} : vector<2x4x14xf32> to vector<2x4x12xf32>
    %308 = vector.extract_strided_slice %91 {offsets = [0, 0, 1], sizes = [2, 4, 12], strides = [1, 1, 1]} : vector<2x4x14xf32> to vector<2x4x12xf32>
    %309 = vector.extract_strided_slice %91 {offsets = [0, 0, 2], sizes = [2, 4, 12], strides = [1, 1, 1]} : vector<2x4x14xf32> to vector<2x4x12xf32>
    %310 = vector.extract_strided_slice %104 {offsets = [0, 0, 0], sizes = [2, 4, 12], strides = [1, 1, 1]} : vector<2x4x14xf32> to vector<2x4x12xf32>
    %311 = vector.extract_strided_slice %104 {offsets = [0, 0, 1], sizes = [2, 4, 12], strides = [1, 1, 1]} : vector<2x4x14xf32> to vector<2x4x12xf32>
    %312 = vector.extract_strided_slice %104 {offsets = [0, 0, 2], sizes = [2, 4, 12], strides = [1, 1, 1]} : vector<2x4x14xf32> to vector<2x4x12xf32>
    %cst_21 = arith.constant 0.000000e+00 : f32
    %313 = vector.broadcast %cst_21 : f32 to vector<2x4x12xf32>
    %314 = vector.extract_strided_slice %1 {offsets = [0, 16], sizes = [4, 1], strides = [1, 1]} : vector<4x28xf32> to vector<4x1xf32>
    %315 = vector.shape_cast %314 : vector<4x1xf32> to vector<4xf32>
    %316 = vector.shape_cast %315 : vector<4xf32> to vector<1x4x1xf32>
    %317 = vector.broadcast %316 : vector<1x4x1xf32> to vector<2x4x12xf32>
    %318 = arith.mulf %317, %307 : vector<2x4x12xf32>
    %319 = arith.addf %313, %318 : vector<2x4x12xf32>
    %320 = vector.extract_strided_slice %1 {offsets = [0, 19], sizes = [4, 1], strides = [1, 1]} : vector<4x28xf32> to vector<4x1xf32>
    %321 = vector.shape_cast %320 : vector<4x1xf32> to vector<4xf32>
    %322 = vector.shape_cast %321 : vector<4xf32> to vector<1x4x1xf32>
    %323 = vector.broadcast %322 : vector<1x4x1xf32> to vector<2x4x12xf32>
    %324 = arith.mulf %323, %310 : vector<2x4x12xf32>
    %325 = arith.addf %319, %324 : vector<2x4x12xf32>
    %326 = vector.extract_strided_slice %1 {offsets = [0, 17], sizes = [4, 1], strides = [1, 1]} : vector<4x28xf32> to vector<4x1xf32>
    %327 = vector.shape_cast %326 : vector<4x1xf32> to vector<4xf32>
    %328 = vector.shape_cast %327 : vector<4xf32> to vector<1x4x1xf32>
    %329 = vector.broadcast %328 : vector<1x4x1xf32> to vector<2x4x12xf32>
    %330 = arith.mulf %329, %308 : vector<2x4x12xf32>
    %331 = arith.addf %325, %330 : vector<2x4x12xf32>
    %332 = vector.extract_strided_slice %1 {offsets = [0, 20], sizes = [4, 1], strides = [1, 1]} : vector<4x28xf32> to vector<4x1xf32>
    %333 = vector.shape_cast %332 : vector<4x1xf32> to vector<4xf32>
    %334 = vector.shape_cast %333 : vector<4xf32> to vector<1x4x1xf32>
    %335 = vector.broadcast %334 : vector<1x4x1xf32> to vector<2x4x12xf32>
    %336 = arith.mulf %335, %311 : vector<2x4x12xf32>
    %337 = arith.addf %331, %336 : vector<2x4x12xf32>
    %338 = vector.extract_strided_slice %1 {offsets = [0, 18], sizes = [4, 1], strides = [1, 1]} : vector<4x28xf32> to vector<4x1xf32>
    %339 = vector.shape_cast %338 : vector<4x1xf32> to vector<4xf32>
    %340 = vector.shape_cast %339 : vector<4xf32> to vector<1x4x1xf32>
    %341 = vector.broadcast %340 : vector<1x4x1xf32> to vector<2x4x12xf32>
    %342 = arith.mulf %341, %309 : vector<2x4x12xf32>
    %343 = arith.addf %337, %342 : vector<2x4x12xf32>
    %344 = vector.extract_strided_slice %1 {offsets = [0, 21], sizes = [4, 1], strides = [1, 1]} : vector<4x28xf32> to vector<4x1xf32>
    %345 = vector.shape_cast %344 : vector<4x1xf32> to vector<4xf32>
    %346 = vector.shape_cast %345 : vector<4xf32> to vector<1x4x1xf32>
    %347 = vector.broadcast %346 : vector<1x4x1xf32> to vector<2x4x12xf32>
    %348 = arith.mulf %347, %312 : vector<2x4x12xf32>
    %349 = arith.addf %343, %348 : vector<2x4x12xf32>
    %cst_22 = arith.constant 0.000000e+00 : f32
    %350 = vector.broadcast %cst_22 : f32 to vector<2x4x12xf32>
    %351 = vector.extract_strided_slice %1 {offsets = [0, 22], sizes = [4, 1], strides = [1, 1]} : vector<4x28xf32> to vector<4x1xf32>
    %352 = vector.shape_cast %351 : vector<4x1xf32> to vector<4xf32>
    %353 = vector.shape_cast %352 : vector<4xf32> to vector<1x4x1xf32>
    %354 = vector.broadcast %353 : vector<1x4x1xf32> to vector<2x4x12xf32>
    %355 = arith.mulf %354, %307 : vector<2x4x12xf32>
    %356 = arith.addf %350, %355 : vector<2x4x12xf32>
    %357 = vector.extract_strided_slice %1 {offsets = [0, 25], sizes = [4, 1], strides = [1, 1]} : vector<4x28xf32> to vector<4x1xf32>
    %358 = vector.shape_cast %357 : vector<4x1xf32> to vector<4xf32>
    %359 = vector.shape_cast %358 : vector<4xf32> to vector<1x4x1xf32>
    %360 = vector.broadcast %359 : vector<1x4x1xf32> to vector<2x4x12xf32>
    %361 = arith.mulf %360, %310 : vector<2x4x12xf32>
    %362 = arith.addf %356, %361 : vector<2x4x12xf32>
    %363 = vector.extract_strided_slice %1 {offsets = [0, 23], sizes = [4, 1], strides = [1, 1]} : vector<4x28xf32> to vector<4x1xf32>
    %364 = vector.shape_cast %363 : vector<4x1xf32> to vector<4xf32>
    %365 = vector.shape_cast %364 : vector<4xf32> to vector<1x4x1xf32>
    %366 = vector.broadcast %365 : vector<1x4x1xf32> to vector<2x4x12xf32>
    %367 = arith.mulf %366, %308 : vector<2x4x12xf32>
    %368 = arith.addf %362, %367 : vector<2x4x12xf32>
    %369 = vector.extract_strided_slice %1 {offsets = [0, 26], sizes = [4, 1], strides = [1, 1]} : vector<4x28xf32> to vector<4x1xf32>
    %370 = vector.shape_cast %369 : vector<4x1xf32> to vector<4xf32>
    %371 = vector.shape_cast %370 : vector<4xf32> to vector<1x4x1xf32>
    %372 = vector.broadcast %371 : vector<1x4x1xf32> to vector<2x4x12xf32>
    %373 = arith.mulf %372, %311 : vector<2x4x12xf32>
    %374 = arith.addf %368, %373 : vector<2x4x12xf32>
    %375 = vector.extract_strided_slice %1 {offsets = [0, 24], sizes = [4, 1], strides = [1, 1]} : vector<4x28xf32> to vector<4x1xf32>
    %376 = vector.shape_cast %375 : vector<4x1xf32> to vector<4xf32>
    %377 = vector.shape_cast %376 : vector<4xf32> to vector<1x4x1xf32>
    %378 = vector.broadcast %377 : vector<1x4x1xf32> to vector<2x4x12xf32>
    %379 = arith.mulf %378, %309 : vector<2x4x12xf32>
    %380 = arith.addf %374, %379 : vector<2x4x12xf32>
    %381 = vector.extract_strided_slice %1 {offsets = [0, 27], sizes = [4, 1], strides = [1, 1]} : vector<4x28xf32> to vector<4x1xf32>
    %382 = vector.shape_cast %381 : vector<4x1xf32> to vector<4xf32>
    %383 = vector.shape_cast %382 : vector<4xf32> to vector<1x4x1xf32>
    %384 = vector.broadcast %383 : vector<1x4x1xf32> to vector<2x4x12xf32>
    %385 = arith.mulf %384, %312 : vector<2x4x12xf32>
    %386 = arith.addf %380, %385 : vector<2x4x12xf32>
    %cst_23 = arith.constant dense<0.000000e+00> : vector<4xf32>
    %387 = vector.multi_reduction <add>, %205, %cst_23 [0, 2] : vector<2x4x12xf32> to vector<4xf32>
    %388 = vector.shape_cast %387 : vector<4xf32> to vector<1x4x1xf32>
    %cst_24 = arith.constant 2.400000e+01 : f32
    %389 = vector.broadcast %cst_24 : f32 to vector<1x4x1xf32>
    %390 = arith.divf %388, %389 : vector<1x4x1xf32>
    %391 = arith.mulf %205, %205 : vector<2x4x12xf32>
    %cst_25 = arith.constant dense<0.000000e+00> : vector<4xf32>
    %392 = vector.multi_reduction <add>, %391, %cst_25 [0, 2] : vector<2x4x12xf32> to vector<4xf32>
    %393 = vector.shape_cast %392 : vector<4xf32> to vector<1x4x1xf32>
    %cst_26 = arith.constant 2.400000e+01 : f32
    %394 = vector.broadcast %cst_26 : f32 to vector<1x4x1xf32>
    %395 = arith.divf %393, %394 : vector<1x4x1xf32>
    %396 = arith.mulf %390, %390 : vector<1x4x1xf32>
    %397 = arith.subf %395, %396 : vector<1x4x1xf32>
    %cst_27 = arith.constant 0.000000e+00 : f32
    %398 = vector.broadcast %cst_27 : f32 to vector<1x4x1xf32>
    %399 = arith.maximumf %397, %398 : vector<1x4x1xf32>
    %cst_28 = arith.constant 9.99999974E-6 : f32
    %400 = vector.broadcast %cst_28 : f32 to vector<1x4x1xf32>
    %401 = arith.addf %399, %400 : vector<1x4x1xf32>
    %402 = math.rsqrt %401 : vector<1x4x1xf32>
    %403 = vector.extract_strided_slice %1 {offsets = [0, 4], sizes = [4, 1], strides = [1, 1]} : vector<4x28xf32> to vector<4x1xf32>
    %404 = vector.shape_cast %403 : vector<4x1xf32> to vector<4xf32>
    %405 = vector.shape_cast %404 : vector<4xf32> to vector<1x4x1xf32>
    %406 = arith.mulf %402, %405 : vector<1x4x1xf32>
    %407 = vector.broadcast %406 : vector<1x4x1xf32> to vector<2x4x12xf32>
    %408 = arith.mulf %205, %407 : vector<2x4x12xf32>
    %409 = vector.extract_strided_slice %1 {offsets = [0, 6], sizes = [4, 1], strides = [1, 1]} : vector<4x28xf32> to vector<4x1xf32>
    %410 = vector.shape_cast %409 : vector<4x1xf32> to vector<4xf32>
    %411 = vector.shape_cast %410 : vector<4xf32> to vector<1x4x1xf32>
    %412 = arith.mulf %390, %406 : vector<1x4x1xf32>
    %413 = arith.subf %411, %412 : vector<1x4x1xf32>
    %414 = vector.broadcast %413 : vector<1x4x1xf32> to vector<2x4x12xf32>
    %415 = arith.addf %408, %414 : vector<2x4x12xf32>
    %cst_29 = arith.constant dense<0.000000e+00> : vector<4xf32>
    %416 = vector.multi_reduction <add>, %306, %cst_29 [0, 2] : vector<2x4x12xf32> to vector<4xf32>
    %417 = vector.shape_cast %416 : vector<4xf32> to vector<1x4x1xf32>
    %cst_30 = arith.constant 2.400000e+01 : f32
    %418 = vector.broadcast %cst_30 : f32 to vector<1x4x1xf32>
    %419 = arith.divf %417, %418 : vector<1x4x1xf32>
    %420 = arith.mulf %306, %306 : vector<2x4x12xf32>
    %cst_31 = arith.constant dense<0.000000e+00> : vector<4xf32>
    %421 = vector.multi_reduction <add>, %420, %cst_31 [0, 2] : vector<2x4x12xf32> to vector<4xf32>
    %422 = vector.shape_cast %421 : vector<4xf32> to vector<1x4x1xf32>
    %cst_32 = arith.constant 2.400000e+01 : f32
    %423 = vector.broadcast %cst_32 : f32 to vector<1x4x1xf32>
    %424 = arith.divf %422, %423 : vector<1x4x1xf32>
    %425 = arith.mulf %419, %419 : vector<1x4x1xf32>
    %426 = arith.subf %424, %425 : vector<1x4x1xf32>
    %cst_33 = arith.constant 0.000000e+00 : f32
    %427 = vector.broadcast %cst_33 : f32 to vector<1x4x1xf32>
    %428 = arith.maximumf %426, %427 : vector<1x4x1xf32>
    %cst_34 = arith.constant 9.99999974E-6 : f32
    %429 = vector.broadcast %cst_34 : f32 to vector<1x4x1xf32>
    %430 = arith.addf %428, %429 : vector<1x4x1xf32>
    %431 = math.rsqrt %430 : vector<1x4x1xf32>
    %432 = vector.extract_strided_slice %1 {offsets = [0, 5], sizes = [4, 1], strides = [1, 1]} : vector<4x28xf32> to vector<4x1xf32>
    %433 = vector.shape_cast %432 : vector<4x1xf32> to vector<4xf32>
    %434 = vector.shape_cast %433 : vector<4xf32> to vector<1x4x1xf32>
    %435 = arith.mulf %431, %434 : vector<1x4x1xf32>
    %436 = vector.broadcast %435 : vector<1x4x1xf32> to vector<2x4x12xf32>
    %437 = arith.mulf %306, %436 : vector<2x4x12xf32>
    %438 = vector.extract_strided_slice %1 {offsets = [0, 7], sizes = [4, 1], strides = [1, 1]} : vector<4x28xf32> to vector<4x1xf32>
    %439 = vector.shape_cast %438 : vector<4x1xf32> to vector<4xf32>
    %440 = vector.shape_cast %439 : vector<4xf32> to vector<1x4x1xf32>
    %441 = arith.mulf %419, %435 : vector<1x4x1xf32>
    %442 = arith.subf %440, %441 : vector<1x4x1xf32>
    %443 = vector.broadcast %442 : vector<1x4x1xf32> to vector<2x4x12xf32>
    %444 = arith.addf %437, %443 : vector<2x4x12xf32>
    %cst_35 = arith.constant dense<0.000000e+00> : vector<4xf32>
    %445 = vector.multi_reduction <add>, %349, %cst_35 [0, 2] : vector<2x4x12xf32> to vector<4xf32>
    %446 = vector.shape_cast %445 : vector<4xf32> to vector<1x4x1xf32>
    %cst_36 = arith.constant 2.400000e+01 : f32
    %447 = vector.broadcast %cst_36 : f32 to vector<1x4x1xf32>
    %448 = arith.divf %446, %447 : vector<1x4x1xf32>
    %449 = arith.mulf %349, %349 : vector<2x4x12xf32>
    %cst_37 = arith.constant dense<0.000000e+00> : vector<4xf32>
    %450 = vector.multi_reduction <add>, %449, %cst_37 [0, 2] : vector<2x4x12xf32> to vector<4xf32>
    %451 = vector.shape_cast %450 : vector<4xf32> to vector<1x4x1xf32>
    %cst_38 = arith.constant 2.400000e+01 : f32
    %452 = vector.broadcast %cst_38 : f32 to vector<1x4x1xf32>
    %453 = arith.divf %451, %452 : vector<1x4x1xf32>
    %454 = arith.mulf %448, %448 : vector<1x4x1xf32>
    %455 = arith.subf %453, %454 : vector<1x4x1xf32>
    %cst_39 = arith.constant 0.000000e+00 : f32
    %456 = vector.broadcast %cst_39 : f32 to vector<1x4x1xf32>
    %457 = arith.maximumf %455, %456 : vector<1x4x1xf32>
    %cst_40 = arith.constant 9.99999974E-6 : f32
    %458 = vector.broadcast %cst_40 : f32 to vector<1x4x1xf32>
    %459 = arith.addf %457, %458 : vector<1x4x1xf32>
    %460 = math.rsqrt %459 : vector<1x4x1xf32>
    %461 = vector.extract_strided_slice %1 {offsets = [0, 12], sizes = [4, 1], strides = [1, 1]} : vector<4x28xf32> to vector<4x1xf32>
    %462 = vector.shape_cast %461 : vector<4x1xf32> to vector<4xf32>
    %463 = vector.shape_cast %462 : vector<4xf32> to vector<1x4x1xf32>
    %464 = arith.mulf %460, %463 : vector<1x4x1xf32>
    %465 = vector.broadcast %464 : vector<1x4x1xf32> to vector<2x4x12xf32>
    %466 = arith.mulf %349, %465 : vector<2x4x12xf32>
    %467 = vector.extract_strided_slice %1 {offsets = [0, 14], sizes = [4, 1], strides = [1, 1]} : vector<4x28xf32> to vector<4x1xf32>
    %468 = vector.shape_cast %467 : vector<4x1xf32> to vector<4xf32>
    %469 = vector.shape_cast %468 : vector<4xf32> to vector<1x4x1xf32>
    %470 = arith.mulf %448, %464 : vector<1x4x1xf32>
    %471 = arith.subf %469, %470 : vector<1x4x1xf32>
    %472 = vector.broadcast %471 : vector<1x4x1xf32> to vector<2x4x12xf32>
    %473 = arith.addf %466, %472 : vector<2x4x12xf32>
    %cst_41 = arith.constant dense<0.000000e+00> : vector<4xf32>
    %474 = vector.multi_reduction <add>, %386, %cst_41 [0, 2] : vector<2x4x12xf32> to vector<4xf32>
    %475 = vector.shape_cast %474 : vector<4xf32> to vector<1x4x1xf32>
    %cst_42 = arith.constant 2.400000e+01 : f32
    %476 = vector.broadcast %cst_42 : f32 to vector<1x4x1xf32>
    %477 = arith.divf %475, %476 : vector<1x4x1xf32>
    %478 = arith.mulf %386, %386 : vector<2x4x12xf32>
    %cst_43 = arith.constant dense<0.000000e+00> : vector<4xf32>
    %479 = vector.multi_reduction <add>, %478, %cst_43 [0, 2] : vector<2x4x12xf32> to vector<4xf32>
    %480 = vector.shape_cast %479 : vector<4xf32> to vector<1x4x1xf32>
    %cst_44 = arith.constant 2.400000e+01 : f32
    %481 = vector.broadcast %cst_44 : f32 to vector<1x4x1xf32>
    %482 = arith.divf %480, %481 : vector<1x4x1xf32>
    %483 = arith.mulf %477, %477 : vector<1x4x1xf32>
    %484 = arith.subf %482, %483 : vector<1x4x1xf32>
    %cst_45 = arith.constant 0.000000e+00 : f32
    %485 = vector.broadcast %cst_45 : f32 to vector<1x4x1xf32>
    %486 = arith.maximumf %484, %485 : vector<1x4x1xf32>
    %cst_46 = arith.constant 9.99999974E-6 : f32
    %487 = vector.broadcast %cst_46 : f32 to vector<1x4x1xf32>
    %488 = arith.addf %486, %487 : vector<1x4x1xf32>
    %489 = math.rsqrt %488 : vector<1x4x1xf32>
    %490 = vector.extract_strided_slice %1 {offsets = [0, 13], sizes = [4, 1], strides = [1, 1]} : vector<4x28xf32> to vector<4x1xf32>
    %491 = vector.shape_cast %490 : vector<4x1xf32> to vector<4xf32>
    %492 = vector.shape_cast %491 : vector<4xf32> to vector<1x4x1xf32>
    %493 = arith.mulf %489, %492 : vector<1x4x1xf32>
    %494 = vector.broadcast %493 : vector<1x4x1xf32> to vector<2x4x12xf32>
    %495 = arith.mulf %386, %494 : vector<2x4x12xf32>
    %496 = vector.extract_strided_slice %1 {offsets = [0, 15], sizes = [4, 1], strides = [1, 1]} : vector<4x28xf32> to vector<4x1xf32>
    %497 = vector.shape_cast %496 : vector<4x1xf32> to vector<4xf32>
    %498 = vector.shape_cast %497 : vector<4xf32> to vector<1x4x1xf32>
    %499 = arith.mulf %477, %493 : vector<1x4x1xf32>
    %500 = arith.subf %498, %499 : vector<1x4x1xf32>
    %501 = vector.broadcast %500 : vector<1x4x1xf32> to vector<2x4x12xf32>
    %502 = arith.addf %495, %501 : vector<2x4x12xf32>
    %cst_47 = arith.constant 0.000000e+00 : f32
    %503 = vector.broadcast %cst_47 : f32 to vector<2x4x116xf32>
    %504 = tpu.concatenate %415, %503 in 2 : vector<2x4x12xf32>, vector<2x4x116xf32> -> vector<2x4x128xf32>
    %c0_48 = arith.constant 0 : index
    %c0_49 = arith.constant 0 : index
    %c0_50 = arith.constant 0 : index
    %505 = vector.load %arg3[%c0_48, %c0_49, %c0_50] : memref<2x16x128xf32, #tpu.memory_space<vmem>>, vector<2x4x128xf32>
    tpu.vector_store %arg3[%c0_48, %c0_49, %c0_50], %504 {strides = array<i32>} : memref<2x16x128xf32, #tpu.memory_space<vmem>>, vector<2x4x128xf32>,
    %506 = tpu.concatenate %444, %503 in 2 : vector<2x4x12xf32>, vector<2x4x116xf32> -> vector<2x4x128xf32>
    %c0_51 = arith.constant 0 : index
    %c4 = arith.constant 4 : index
    %c0_52 = arith.constant 0 : index
    %507 = vector.load %arg3[%c0_51, %c4, %c0_52] : memref<2x16x128xf32, #tpu.memory_space<vmem>>, vector<2x4x128xf32>
    tpu.vector_store %arg3[%c0_51, %c4, %c0_52], %506 {strides = array<i32>} : memref<2x16x128xf32, #tpu.memory_space<vmem>>, vector<2x4x128xf32>,
    %508 = tpu.concatenate %473, %503 in 2 : vector<2x4x12xf32>, vector<2x4x116xf32> -> vector<2x4x128xf32>
    %c0_53 = arith.constant 0 : index
    %c8 = arith.constant 8 : index
    %c0_54 = arith.constant 0 : index
    %509 = vector.load %arg3[%c0_53, %c8, %c0_54] : memref<2x16x128xf32, #tpu.memory_space<vmem>>, vector<2x4x128xf32>
    tpu.vector_store %arg3[%c0_53, %c8, %c0_54], %508 {strides = array<i32>} : memref<2x16x128xf32, #tpu.memory_space<vmem>>, vector<2x4x128xf32>,
    %510 = tpu.concatenate %502, %503 in 2 : vector<2x4x12xf32>, vector<2x4x116xf32> -> vector<2x4x128xf32>
    %c0_55 = arith.constant 0 : index
    %c12 = arith.constant 12 : index
    %c0_56 = arith.constant 0 : index
    %511 = vector.load %arg3[%c0_55, %c12, %c0_56] : memref<2x16x128xf32, #tpu.memory_space<vmem>>, vector<2x4x128xf32>
    tpu.vector_store %arg3[%c0_55, %c12, %c0_56], %510 {strides = array<i32>} : memref<2x16x128xf32, #tpu.memory_space<vmem>>, vector<2x4x128xf32>,
    return
  }
}

</mosaic_0001>

<bundles_post_ra>
// kernel: gcu_forward.1
= control target key start
LH: loop header
LB: loop body
LE: loop exit
PB: predicated region body
PF: predicated region fallthrough
CT: control target
= control target key end

     0   :  { %v1653_v0 = vmov 0   ;;  %v1654_v9 = vmov 1   ;;  %v1655_v15 = vmov 3   ;;  %v2500_v24 = vmov 5   ;;  %s1674_s18 = smov 127   ;;  %s1688_s21 = smov 2   ;;  %s2493_s2 = inlined_call_operand.vmem [shape: f32[4,24], index: 2, kind: input, shape index: {}]   ;;  %s2494_s0 = inlined_call_operand.vmem [shape: f32[2,4,16], index: 0, kind: input, shape index: {}]   ;;  %s2495_s1 = inlined_call_operand.vmem [shape: f32[4,28], index: 1, kind: input, shape index: {}]   ;;  %s2496_s3 = inlined_call_operand.vmem [shape: f32[2,16,128], index: 3, kind: output, shape index: {}]  }
   0x1   :  { %1584 = vset.pattern.permute.xlu2 %v1653_v0  ;;  %v1716_v1 = vld [vmem:[%s2493_s2] sm:$0xf]  ;;  %v1721_v2 = vld [vmem:[%s2494_s0 + $0x4] sm:$0xf]  ;;  %1585 = vset.pattern.permute.xlu1 %v1654_v9  ;;  %v1657_v25 = vmov 4   ;;  %v1663_v43 = vmov 6  }
   0x2   :  { %812 = vperm.xlu2 %1584, %v1716_v1   ;;  %v173_v3 = vand.u32 2147483647, %v1721_v2  ;;  %v176_v4 = vand.u32 2139095040, %v1721_v2  ;;  %v1729_v5 = vld [vmem:[%s2494_s0] sm:$0xf]  ;;  %822 = vperm.xlu1 %1585, %v1716_v1   ;;  %s1672_s0 = smov 126  }
   0x3   :  { %v18_v6 = vand.u32 2147483647, %v1729_v5  ;;  %v21_v7 = vand.u32 2139095040, %v1729_v5  ;;  %1588 = vset.pattern.permute.xlu0 %v2500_v24  ;;  %v1658_v27 = vmov 683565275  }
   0x4   :  { %v177_v8 = vshrl.u32 %v176_v4, 23  ;;  %v180_v10 = vand.u32 8388607, %v173_v3  ;;  %v1659_v29 = vmov 2475754826   ;;  %868 = vperm.xlu0 %1588, %v1716_v1  }
   0x5   :  { %v22_v11 = vshrl.u32 %v21_v7, 23  ;;  %v25_v14 = vand.u32 8388607, %v18_v6  ;;  %v1660_v31 = vmov 2131351028  }
   0x6   :  { %v1536_v12 = vadd.s32 4294967169, %v177_v8  ;;  %v181_v17 = vor.u32 8388608, %v180_v10  ;;  %v1661_v33 = vmov 2102212464   ;;  %v1662_v35 = vmov 920167782  }
   0x7   :  { %v1533_v13 = vadd.s32 4294967169, %v22_v11  ;;  %v26_v20 = vor.u32 8388608, %v25_v14  ;;  %v1664_v45 = vmov 1326507024  }
   0x8   :  { %v183_v16 = vadd.s32 1, %v1536_v12  ;;  %v1741_v23 = vshll.u32 %v181_v17, 8 }
   0x9   :  { %v28_v18 = vadd.s32 1, %v1533_v13  ;;  %v1752_v38 = vshll.u32 %v26_v20, 8  ;;  %v2499_v20 = vmov 7  }
   0xa   :  { %1586 = vset.pattern.permute.xlu2 %v1655_v15  ;;  %vm184_vm0 = vcmp.gt.s32.totalorder %v183_v16, 0  ;;  %1587 = vset.pattern.permute.xlu1 %v1657_v25  ;;  %v222_v62 = vand.u32 65535, %v1741_v23  ;;  %v223_v63 = vshrl.u32 %v1741_v23, 16 }
   0xb   :  { %842 = vperm.xlu2 %1586, %v1716_v1   ;;  %v185_v19 = vsel %vm184_vm0, %v183_v16, 0  ;;  %vm29_vm1 = vcmp.gt.s32.totalorder %v28_v18, 0  ;;  %852 = vperm.xlu1 %1587, %v1716_v1   ;;  %v1775_v10 = vand.u32 65535, %v1752_v38 }
   0xc   :  { %v187_v21 = vand.u32 31, %v185_v19  ;;  %v186_v22 = vshrl.u32 %v185_v19, 5  ;;  %v30_v37 = vsel %vm29_vm1, %v28_v18, 0 }
   0xd   :  { %v1761_v50 = vand.u32 31, %v30_v37  ;;  %v1772_v8 = vshrl.u32 %v30_v37, 5 }
   0xe   :  { %v188_v26 = vsub.s32 32, %v187_v21  ;;  %v190_v28 = vshll.u32 %v1658_v27, %v187_v21  ;;  %v193_v30 = vshll.u32 %v1659_v29, %v187_v21  ;;  %v196_v32 = vshll.u32 %v1660_v31, %v187_v21 }
   0xf   :  { %v199_v34 = vshll.u32 %v1661_v33, %v187_v21  ;;  %v202_v36 = vshll.u32 %v1662_v35, %v187_v21  ;;  %vm205_vm2 = vcmp.lt.s32.totalorder %v186_v22, 1  ;;  %vm208_vm3 = vcmp.lt.s32.totalorder %v186_v22, 4 }
  0x10   :  { %v189_v39 = vshrl.u32 %v1658_v27, %v188_v26  ;;  %v191_v40 = vshrl.u32 %v1659_v29, %v188_v26  ;;  %v194_v41 = vshrl.u32 %v1660_v31, %v188_v26  ;;  %v197_v42 = vshrl.u32 %v1661_v33, %v188_v26 }
  0x11   :  { %v200_v44 = vshrl.u32 %v1662_v35, %v188_v26  ;;  %v203_v46 = vshrl.u32 %v1664_v45, %v188_v26  ;;  %vm206_vm4 = vcmp.lt.s32.totalorder %v186_v22, 2  ;;  %vm207_vm5 = vcmp.lt.s32.totalorder %v186_v22, 3 }
  0x12   :  { %v192_v47 = vor.u32 %v191_v40, %v190_v28  ;;  %v195_v48 = vor.u32 %v194_v41, %v193_v30  ;;  %v198_v49 = vor.u32 %v197_v42, %v196_v32  ;;  %v1767_v60 = vsub.s32 32, %v1761_v50 }
  0x13   :  { %1589 = vset.pattern.permute.xlu2 %v1663_v43  ;;  %v201_v51 = vor.u32 %v200_v44, %v199_v34  ;;  %v204_v52 = vor.u32 %v203_v46, %v202_v36  ;;  %v35_v18 = vshll.u32 %v1658_v27, %v1761_v50  ;;  %v38_v30 = vshll.u32 %v1659_v29, %v1761_v50 }
  0x14   :  { %884 = vperm.xlu2 %1589, %v1716_v1   ;;  %v209_v53 = vsel %vm205_vm2, %v189_v39, %v192_v47  ;;  %v210_v54 = vsel %vm208_vm3, %v198_v49, 2102212464  ;;  %v213_v55 = vsel %vm205_vm2, %v192_v47, %v195_v48  ;;  %v217_v56 = vsel %vm205_vm2, %v195_v48, %v198_v49 }
  0x15   :  { %v211_v57 = vsel %vm207_vm5, %v195_v48, %v210_v54  ;;  %v214_v58 = vsel %vm208_vm3, %v201_v51, 920167782  ;;  %v218_v59 = vsel %vm208_vm3, %v204_v52, 1326507024  ;;  %v36_v19 = vshrl.u32 %v1659_v29, %v1767_v60 }
  0x16   :  { %v215_v61 = vsel %vm207_vm5, %v198_v49, %v214_v58  ;;  %v219_v7 = vsel %vm207_vm5, %v201_v51, %v218_v59  ;;  %v1778_v11 = vsel %vm206_vm4, %v209_v53, %v211_v57  ;;  %vm50_vm6 = vcmp.lt.s32.totalorder %v1772_v8, 1 }
  0x17   :  { %v216_v4 = vsel %vm206_vm4, %v213_v55, %v215_v61  ;;  %v220_v12 = vsel %vm206_vm4, %v217_v56, %v219_v7  ;;  %v39_v29 = vshrl.u32 %v1660_v31, %v1767_v60  ;;  %v1791_v53 = vor.u32 %v36_v19, %v35_v18 }
  0x18   :  { %v246_v13 = vand.u32 65535, %v216_v4  ;;  %v247_v14 = vshrl.u32 %v216_v4, 16  ;;  %v224_v16 = vand.u32 65535, %v220_v12  ;;  %v225_v17 = vshrl.u32 %v220_v12, 16 }
  0x19   :  { %v41_v56 = vshll.u32 %v1660_v31, %v1761_v50  ;;  %v1797_v59 = vor.u32 %v39_v29, %v38_v30  ;;  %v44_v4 = vshll.u32 %v1661_v33, %v1761_v50  ;;  %v1666_v7 = vmov 8  }
  0x1a   :  { %v248_v21 = vmul.u32 %v246_v13, %v222_v62  ;;  %v249_v26 = vmul.u32 %v247_v14, %v222_v62  ;;  %v250_v28 = vmul.u32 %v246_v13, %v223_v63  ;;  %v226_v22 = vmul.u32 %v224_v16, %v222_v62 }
  0x1b   :  { %v227_v32 = vmul.u32 %v225_v17, %v222_v62  ;;  %v228_v34 = vmul.u32 %v224_v16, %v223_v63  ;;  %v251_v36 = vmul.u32 %v247_v14, %v223_v63  ;;  %v229_v37 = vmul.u32 %v225_v17, %v223_v63 }
  0x1c   :  { %1590 = vset.pattern.permute.xlu2 %v2499_v20  ;;  %v252_v39 = vshll.u32 %v249_v26, 16  ;;  %v253_v40 = vshrl.u32 %v249_v26, 16  ;;  %v254_v41 = vshll.u32 %v250_v28, 16  ;;  %v255_v47 = vshrl.u32 %v250_v28, 16 }
  0x1d   :  { %900 = vperm.xlu2 %1590, %v1716_v1   ;;  %v230_v42 = vshll.u32 %v227_v32, 16  ;;  %v231_v44 = vshrl.u32 %v227_v32, 16  ;;  %v232_v46 = vshll.u32 %v228_v34, 16  ;;  %v233_v48 = vshrl.u32 %v228_v34, 16 }
  0x1e   :  { %vm256_vm7 = vc.u32 %v248_v21, %v252_v39  ;;  %v258_v49 = vadd.s32 %v252_v39, %v248_v21  ;;  %v42_v63 = vshrl.u32 %v1661_v33, %v1767_v60  ;;  %v45_v31 = vshrl.u32 %v1662_v35, %v1767_v60 }
  0x1f   :  { %vm234_vm8 = vc.u32 %v226_v22, %v230_v42  ;;  %v236_v51 = vadd.s32 %v230_v42, %v226_v22  ;;  %v257_v52 = vsel %vm256_vm7, 1, %v1653_v0  ;;  %v47_v13 = vshll.u32 %v1662_v35, %v1761_v50 }
  0x20   :  { %v235_v54 = vsel %vm234_vm8, 1, %v1653_v0  ;;  %v259_v55 = vadd.s32 %v257_v52, %v251_v36  ;;  %vm260_vm9 = vc.u32 %v258_v49, %v254_v41  ;;  %v48_v14 = vshrl.u32 %v1664_v45, %v1767_v60 }
  0x21   :  { %v237_v57 = vadd.s32 %v235_v54, %v229_v37  ;;  %vm238_vm10 = vc.u32 %v236_v51, %v232_v46  ;;  %v261_v58 = vsel %vm260_vm9, 1, %v1653_v0  ;;  %v1812_v16 = vadd.s32 %v258_v49, %v254_v41 }
  0x22   :  { %v239_v61 = vsel %vm238_vm10, 1, %v1653_v0  ;;  %v263_v62 = vadd.s32 %v261_v58, %v259_v55  ;;  %v43_v18 = vor.u32 %v42_v63, %v41_v56  ;;  %vm53_vm11 = vcmp.lt.s32.totalorder %v1772_v8, 4 }
  0x23   :  { %v241_v12 = vadd.s32 %v239_v61, %v237_v57  ;;  %v46_v19 = vor.u32 %v45_v31, %v44_v4  ;;  %v49_v21 = vor.u32 %v48_v14, %v47_v13  ;;  %vm52_vm12 = vcmp.lt.s32.totalorder %v1772_v8, 3 }
  0x24   :  { %v264_v17 = vadd.s32 %v263_v62, %v253_v40  ;;  %vm51_vm13 = vcmp.lt.s32.totalorder %v1772_v8, 2  ;;  %v58_v35 = vsel %vm50_vm6, %v1791_v53, %v1797_v59  ;;  %v62_v45 = vsel %vm50_vm6, %v1797_v59, %v43_v18 }
  0x25   :  { %1591 = vset.pattern.permute.xlu2 %v1666_v7  ;;  %v242_v33 = vadd.s32 %v241_v12, %v231_v44  ;;  %v266_v28 = vmul.u32 %v1741_v23, %v1778_v11  ;;  %v59_v30 = vsel %vm53_vm11, %v46_v19, 920167782  ;;  %v63_v22 = vsel %vm53_vm11, %v49_v21, 1326507024 }
  0x26   :  { %916 = vperm.xlu2 %1591, %v1716_v1   ;;  %v265_v26 = vadd.s32 %v264_v17, %v255_v47  ;;  %v60_v34 = vsel %vm52_vm12, %v43_v18, %v59_v30  ;;  %v64_v36 = vsel %vm52_vm12, %v46_v19, %v63_v22  ;;  %v68_v37 = vshrl.u32 %v1752_v38, 16 }
  0x27   :  { %v1824_v50 = vadd.s32 %v242_v33, %v233_v48  ;;  %v61_v23 = vsel %vm51_vm13, %v58_v35, %v60_v34  ;;  %v65_v11 = vsel %vm51_vm13, %v62_v45, %v64_v36  ;;  %v1667_v47 = vmov 9  }
  0x28   :  { %v269_v32 = vadd.s32 1, %v265_v26  ;;  %v69_v40 = vand.u32 65535, %v65_v11  ;;  %v70_v41 = vshrl.u32 %v65_v11, 16  ;;  %v91_v42 = vand.u32 65535, %v61_v23 }
  0x29   :  { %vm268_vm14 = vc.u32 %v1824_v50, %v1812_v16  ;;  %v92_v46 = vshrl.u32 %v61_v23, 16  ;;  %v1668_v30 = vmov 10   ;;  %vm174_vm7 = vcmp.le.f32.partialorder %v173_v3, 0.7853982 }
  0x2a   :  { %v270_v39 = vsel %vm268_vm14, %v269_v32, %v265_v26  ;;  %v71_v48 = vmul.u32 %v69_v40, %v1775_v10  ;;  %v72_v49 = vmul.u32 %v70_v41, %v1775_v10  ;;  %v73_v29 = vmul.u32 %v69_v40, %v68_v37 }
  0x2b   :  { %v271_v44 = vadd.s32 %v270_v39, %v266_v28  ;;  %v94_v52 = vmul.u32 %v92_v46, %v1775_v10  ;;  %v74_v54 = vmul.u32 %v70_v41, %v68_v37  ;;  %v93_v57 = vmul.u32 %v91_v42, %v1775_v10 }
  0x2c   :  { %v75_v55 = vshll.u32 %v72_v49, 16  ;;  %v77_v56 = vshll.u32 %v73_v29, 16  ;;  %v95_v61 = vmul.u32 %v91_v42, %v68_v37  ;;  %v96_v4 = vmul.u32 %v92_v46, %v68_v37 }
  0x2d   :  { %v272_v51 = vadd.s32 536870912, %v271_v44  ;;  %v97_v62 = vshll.u32 %v94_v52, 16  ;;  %v76_v31 = vshrl.u32 %v72_v49, 16  ;;  %v34_v10 = vshrl.u32 %v1658_v27, %v1767_v60 }
  0x2e   :  { %1592 = vset.pattern.permute.xlu2 %v1667_v47  ;;  %vm79_vm15 = vc.u32 %v71_v48, %v75_v55  ;;  %v81_v63 = vadd.s32 %v75_v55, %v71_v48  ;;  %v99_v17 = vshll.u32 %v95_v61, 16  ;;  %v55_v26 = vsel %vm53_vm11, %v43_v18, 2102212464 }
  0x2f   :  { %932 = vperm.xlu2 %1592, %v1716_v1   ;;  %v1849_v58 = vshrl.u32 %v272_v51, 30  ;;  %v80_v13 = vsel %vm79_vm15, 1, %v1653_v0  ;;  %vm101_vm1 = vc.u32 %v93_v57, %v97_v62  ;;  %v103_v45 = vadd.s32 %v97_v62, %v93_v57 }
  0x30   :  { %v82_v14 = vadd.s32 %v80_v13, %v74_v54  ;;  %vm83_vm0 = vc.u32 %v81_v63, %v77_v56  ;;  %v102_v21 = vsel %vm101_vm1, 1, %v1653_v0  ;;  %v78_v32 = vshrl.u32 %v73_v29, 16 }
  0x31   :  { %v274_v12 = vshll.u32 %v1849_v58, 30  ;;  %v84_v19 = vsel %vm83_vm0, 1, %v1653_v0  ;;  %v104_v28 = vadd.s32 %v102_v21, %v96_v4  ;;  %v98_v27 = vshrl.u32 %v94_v52, 16 }
  0x32   :  { %v86_v35 = vadd.s32 %v84_v19, %v82_v14  ;;  %vm105_vm3 = vc.u32 %v103_v45, %v99_v17  ;;  %v54_v36 = vsel %vm50_vm6, %v34_v10, %v1791_v53  ;;  %v56_v18 = vsel %vm52_vm12, %v1797_v59, %v55_v26 }
  0x33   :  { %v275_v33 = vsub.s32 %v271_v44, %v274_v12  ;;  %v106_v37 = vsel %vm105_vm3, 1, %v1653_v0  ;;  %v100_v11 = vshrl.u32 %v95_v61, 16  ;;  %v107_v41 = vadd.s32 %v103_v45, %v99_v17 }
  0x34   :  { %v87_v34 = vadd.s32 %v86_v35, %v76_v31  ;;  %v108_v39 = vadd.s32 %v106_v37, %v104_v28  ;;  %v57_v44 = vsel %vm51_vm13, %v54_v36, %v56_v18  ;;  %v267_v48 = vadd.s32 %v1812_v16, %v1824_v50 }
  0x35   :  { %vm276_vm2 = vcmp.lt.s32.totalorder %v275_v33, 0  ;;  %v277_v22 = vsub.s32 0, %v275_v33  ;;  %v111_v59 = vmul.u32 %v1752_v38, %v57_v44  ;;  %vm175_vm6 = vcmp.lt.s32.totalorder %v1721_v2, 0 }
  0x36   :  { %v88_v40 = vadd.s32 %v87_v34, %v78_v32  ;;  %v109_v46 = vadd.s32 %v108_v39, %v98_v27  ;;  %v297_v13 = vsub.s32 4, %v1849_v58  ;;  %vm316_vm13 = vweird.f32 %v1721_v2 }
  0x37   :  { %1593 = vset.pattern.permute.xlu2 %v1668_v30  ;;  %v278_v60 = vsel %vm276_vm2, %v277_v22, %v275_v33  ;;  %vm20_vm14 = vcmp.lt.s32.totalorder %v1729_v5, 0  ;;  %vm19_vm15 = vcmp.le.f32.partialorder %v18_v6, 0.7853982  ;;  %vm161_vm3 = vweird.f32 %v1729_v5 }
  0x38   :  { %948 = vperm.xlu2 %1593, %v1716_v1   ;;  %v279_v23 = vclz %v278_v60  ;;  %v110_v53 = vadd.s32 %v109_v46, %v100_v11  ;;  %vm113_vm5 = vc.u32 %v88_v40, %v107_v41  ;;  %v298_v19 = vsel %vm175_vm6, %v297_v13, %v1849_v58 }
  0x39   :  { %v1882_v28 = vsel %vm174_vm7, 0, %v298_v19  ;;  %v112_v36 = vadd.s32 %v107_v41, %v88_v40 }
  0x3a   :  { %v1537_v42 = vadd.s32 4294967294, %v279_v23  ;;  %v114_v54 = vadd.s32 1, %v110_v53  ;;  %v317_v3 = vadd.s32 3, %v1882_v28 }
  0x3c   :  { %vm1538_vm4 = vcmp.lt.s32.totalorder %v1537_v42, 0  ;;  %v115_v57 = vsel %vm113_vm5, %v114_v54, %v110_v53 }
  0x3d   :  { %v282_v49 = vsel %vm1538_vm4, 0, %v1537_v42  ;;  %v116_v61 = vadd.s32 %v115_v57, %v111_v59 }
  0x3e   :  { %v283_v29 = vsub.s32 32, %v282_v49  ;;  %v284_v51 = vshll.u32 %v275_v33, %v282_v49  ;;  %v287_v52 = vsub.s32 4294967266, %v282_v49 }
  0x3f   :  { %v117_v63 = vadd.s32 536870912, %v116_v61 }
  0x40   :  { %v285_v55 = vshrl.u32 %v267_v48, %v283_v29  ;;  %v288_v56 = vadd.s32 127, %v287_v52  ;;  %v318_v48 = vand.u32 3, %v317_v3 }
  0x41   :  { %v1873_v16 = vshrl.u32 %v117_v63, 30  ;;  %v2498_v63 = vmov 14  }
  0x42   :  { %v286_v8 = vor.u32 %v285_v55, %v284_v51  ;;  %v289_v62 = vshll.u32 %v288_v56, 23  ;;  %vm323_vm10 = vcmp.eq.s32.totalorder %v318_v48, 2  ;;  %vm320_vm11 = vcmp.eq.s32.totalorder %v318_v48, 0  ;;  %1597 = vset.pattern.permute.xlu0 %v2498_v63 }
  0x43   :  { %v119_v31 = vshll.u32 %v1873_v16, 30  ;;  %vm319_vm12 = vcmp.lt.s32.totalorder %v318_v48, 2 }
  0x44   :  { %v290_v4 = vor.u32 4788187, %v289_v62  ;;  %v293_v12 = vcvt.s32.f32 %v286_v8  ;;  %v1669_v62 = vmov 11  }
  0x45   :  { %v120_v14 = vsub.s32 %v116_v61, %v119_v31  ;;  %1594 = vset.pattern.permute.xlu2 %v1669_v62  ;;  %v142_v31 = vsub.s32 4, %v1873_v16 }
  0x46   :  { %v291_v50 = vand.u32 2147483647, %v290_v4  ;;  %964 = vperm.xlu2 %1594, %v1716_v1  }
  0x47   :  { %vm121_vm8 = vcmp.lt.s32.totalorder %v120_v14, 0  ;;  %v122_v33 = vsub.s32 0, %v120_v14 }
  0x48   :  { %v294_v38 = vmul.f32 %v293_v12, %v291_v50  ;;  %v2497_v12 = vmov 13  }
  0x49   :  { %v123_v26 = vsel %vm121_vm8, %v122_v33, %v120_v14  ;;  %1596 = vset.pattern.permute.xlu1 %v2497_v12 }
  0x4a   :  { %v295_v17 = vxor.u32 2147483648, %v294_v38  ;;  %v124_v45 = vclz %v123_v26 }
  0x4c   :  { %v296_v10 = vsel %vm175_vm6, %v295_v17, %v294_v38  ;;  %v1534_v34 = vadd.s32 4294967294, %v124_v45 }
  0x4d   :  { %v299_v21 = vsel %vm174_vm7, %v1721_v2, %v296_v10  ;;  %v143_v10 = vsel %vm20_vm14, %v142_v31, %v1873_v16 }
  0x4e   :  { %v301_v35 = vmul.f32 %v299_v21, %v299_v21  ;;  %vm1535_vm9 = vcmp.lt.s32.totalorder %v1534_v34, 0  ;;  %v145_v26 = vsel %vm19_vm15, 0, %v143_v10 }
  0x4f   :  { %v127_v18 = vsel %vm1535_vm9, 0, %v1534_v34 }
  0x50   :  { %v302_v22 = vmul.f32 -0.001358992, %v301_v35  ;;  %v309_v32 = vmul.f32 -0.00019511016, %v301_v35  ;;  %v128_v58 = vsub.s32 32, %v127_v18  ;;  %v129_v11 = vshll.u32 %v120_v14, %v127_v18 }
  0x51   :  { %v132_v39 = vsub.s32 4294967266, %v127_v18 }
  0x52   :  { %v303_v27 = vadd.f32 0.041655596, %v302_v22  ;;  %v310_v60 = vadd.f32 0.008332121, %v309_v32  ;;  %v130_v46 = vshrl.u32 %v112_v36, %v128_v58  ;;  %v162_v32 = vadd.s32 3, %v145_v26 }
  0x53   :  { %v133_v53 = vadd.s32 127, %v132_v39 }
  0x54   :  { %v304_v37 = vmul.f32 %v303_v27, %v301_v35  ;;  %v311_v23 = vmul.f32 %v310_v60, %v301_v35  ;;  %v131_v29 = vor.u32 %v130_v46, %v129_v11  ;;  %v163_v16 = vand.u32 3, %v162_v32 }
  0x55   :  { %v134_v51 = vshll.u32 %v133_v53, 23 }
  0x56   :  { %v305_v42 = vadd.f32 -0.4999988, %v304_v37  ;;  %v312_v44 = vadd.f32 -0.16666654, %v311_v23  ;;  %v138_v54 = vcvt.s32.f32 %v131_v29  ;;  %vm168_vm0 = vcmp.eq.s32.totalorder %v163_v16, 2 }
  0x57   :  { %v135_v41 = vor.u32 4788187, %v134_v51  ;;  %vm165_vm1 = vcmp.eq.s32.totalorder %v163_v16, 0  ;;  %vm164_vm2 = vcmp.lt.s32.totalorder %v163_v16, 2  ;;  %v1931_v29 = vld [vmem:[%s2495_s1] sm:$0xf] }
  0x58   :  { %v306_v49 = vmul.f32 %v305_v42, %v301_v35  ;;  %v313_v59 = vmul.f32 %v312_v44, %v301_v35  ;;  %v1673_v44 = vmov 16   ;;  %v1675_v51 = vmov 19  }
  0x59   :  { %v136_v57 = vand.u32 2147483647, %v135_v41  ;;  %v1679_v16 = vmov 21  }
  0x5a   :  { %v1885_v52 = vadd.f32 1.0, %v306_v49  ;;  %v314_v40 = vadd.f32 1.0, %v313_v59  ;;  %v474_v59 = vand.u32 3, %v145_v26 }
  0x5b   :  { %v139_v4 = vmul.f32 %v138_v54, %v136_v57  ;;  %v628_v54 = vand.u32 3, %v1882_v28 }
  0x5c   :  { %v1887_v55 = vmul.f32 %v314_v40, %v299_v21  ;;  %v324_v56 = vxor.u32 2147483648, %v1885_v52  ;;  %vm476_vm4 = vcmp.eq.s32.totalorder %v474_v59, 0  ;;  %vm479_vm5 = vcmp.eq.s32.totalorder %v474_v59, 2 }
  0x5d   :  { %v140_v13 = vxor.u32 2147483648, %v139_v4  ;;  %vm475_vm6 = vcmp.lt.s32.totalorder %v474_v59, 2  ;;  %vm630_vm7 = vcmp.eq.s32.totalorder %v628_v54, 0  ;;  %vm633_vm8 = vcmp.eq.s32.totalorder %v628_v54, 2 }
  0x5e   :  { %v321_v61 = vxor.u32 2147483648, %v1887_v55  ;;  %v325_v8 = vsel %vm323_vm10, %v324_v56, %v1887_v55  ;;  %vm629_vm9 = vcmp.lt.s32.totalorder %v628_v54, 2  ;;  %v635_v28 = vsel %vm633_vm8, %v324_v56, %v1887_v55 }
  0x5f   :  { %v141_v33 = vsel %vm20_vm14, %v140_v13, %v139_v4  ;;  %vm640_vm10 = vcmask 125952  }
  0x60   :  { %v322_v50 = vsel %vm320_vm11, %v1885_v52, %v321_v61  ;;  %v144_v19 = vsel %vm19_vm15, %v1729_v5, %v141_v33 }
  0x61   :  { %v326_v38 = vsel %vm319_vm12, %v322_v50, %v325_v8  ;;  %v146_v21 = vmul.f32 %v144_v19, %v144_v19  ;;  %v1939_v8 = vpop.permute.xlu2 %812  ;;  %v632_v50 = vsel %vm630_vm7, %v1885_v52, %v321_v61 }
  0x62   :  { %v327_v14 = vsel %vm316_vm13, nan, %v326_v38  ;;  %v1676_v38 = vmov 17   ;;  %v636_v13 = vsel %vm629_vm9, %v632_v50, %v635_v28  ;;  %v1684_v28 = vmov 23  }
  0x63   :  { %v1909_v17 = vmul.f32 %v327_v14, %v1721_v2  ;;  %v147_v35 = vmul.f32 -0.001358992, %v146_v21  ;;  %v154_v6 = vmul.f32 -0.00019511016, %v146_v21  ;;  %v637_v14 = vsel %vm316_vm13, nan, %v636_v13 }
  0x64   :  { %v1960_v61 = vmul.f32 %v637_v14, %v1721_v2 }
  0x65   :  { %716 = vrot.lane.b32.xlu1 %v1909_v17, %s1672_s0  ;;  %v148_v45 = vadd.f32 0.041655596, %v147_v35  ;;  %v155_v22 = vadd.f32 0.008332121, %v154_v6  ;;  %v642_v35 = vsel %vm640_vm10, %v1909_v17, 0.0  ;;  %v655_v32 = vmul.f32 %v1909_v17, %v1909_v17 }
  0x66   :  { %v677_v2 = vsel %vm640_vm10, %v1960_v61, 0.0  ;;  %v683_v54 = vmul.f32 %v1960_v61, %v1960_v61 }
  0x67   :  { %v149_v34 = vmul.f32 %v148_v45, %v146_v21  ;;  %v156_v27 = vmul.f32 %v155_v22, %v146_v21 }
  0x69   :  { %v150_v60 = vadd.f32 -0.4999988, %v149_v34  ;;  %v157_v36 = vadd.f32 -0.16666654, %v156_v27  ;;  %v1957_v33 = vpop.permute.xlu2 %842  ;;  %v1678_v34 = vmov 12  }
  0x6a   :  { %1595 = vset.pattern.permute.xlu2 %v1678_v34 }
  0x6b   :  { %v151_v3 = vmul.f32 %v150_v60, %v146_v21  ;;  %v158_v18 = vmul.f32 %v157_v36, %v146_v21  ;;  %v657_v60 = vsel %vm640_vm10, %v655_v32, 0.0 }
  0x6d   :  { %990 = vperm.xlu1 %1596, %v1716_v1   ;;  %v152_v37 = vadd.f32 1.0, %v151_v3  ;;  %v159_v23 = vadd.f32 1.0, %v158_v18 }
  0x6f   :  { %v160_v58 = vmul.f32 %v159_v23, %v144_v19  ;;  %v169_v11 = vxor.u32 2147483648, %v152_v37  ;;  %v1677_v19 = vmov 26   ;;  %v1681_v23 = vmov 22  }
  0x71   :  { %v166_v39 = vxor.u32 2147483648, %v160_v58  ;;  %v170_v42 = vsel %vm168_vm0, %v169_v11, %v160_v58  ;;  %v481_v41 = vsel %vm479_vm5, %v169_v11, %v160_v58 }
  0x73   :  { %v167_v46 = vsel %vm165_vm1, %v152_v37, %v166_v39  ;;  %v478_v40 = vsel %vm476_vm4, %v152_v37, %v166_v39  ;;  %v2501_v37 = vmov 15   ;;  %v1682_v39 = vmov 18  }
  0x74   :  { %v171_v48 = vsel %vm164_vm2, %v167_v46, %v170_v42  ;;  %v482_v57 = vsel %vm475_vm6, %v478_v40, %v481_v41  ;;  %v1996_v36 = vpop.permute.xlu1 %822  ;;  %vm1308_vm2 = vcmask 93184  }
  0x75   :  { %1599 = vset.pattern.permute.xlu1 %v1673_v44  ;;  %v172_v53 = vsel %vm161_vm3, nan, %v171_v48  ;;  %v483_v4 = vsel %vm161_vm3, nan, %v482_v57 }
  0x76   :  { %1020 = vperm.xlu1 %1599, %v1716_v1   ;;  %v1922_v49 = vmul.f32 %v172_v53, %v1729_v5  ;;  %v1950_v31 = vmul.f32 %v483_v4, %v1729_v5  ;;  %v1965_v5 = vpop.permute.xlu2 %884  ;;  %v1683_v53 = vmov 20   ;;  %v2014_v40 = vpop.permute.xlu0 %868  ;;  %v685_v4 = vsel %vm640_vm10, %v683_v54, 0.0 }
  0x78   :  { %714 = vrot.lane.b32.xlu0 %v1922_v49, %s1672_s0  ;;  %706 = vrot.lane.b32.xlu2 %v1922_v49, %s1674_s18  ;;  %v676_v52 = vsel %vm640_vm10, %v1950_v31, 0.0  ;;  %v641_v26 = vsel %vm640_vm10, %v1922_v49, 0.0  ;;  %v654_v22 = vmul.f32 %v1922_v49, %v1922_v49  ;;  %v682_v41 = vmul.f32 %v1950_v31, %v1950_v31 }
  0x79   :  { %v678_v56 = vadd.f32 %v677_v2, %v676_v52  ;;  %v643_v45 = vadd.f32 %v642_v35, %v641_v26  ;;  %v1685_v26 = vmov 32.0  }
  0x7a   :  { %v656_v27 = vsel %vm640_vm10, %v654_v22, 0.0  ;;  %v684_v57 = vsel %vm640_vm10, %v682_v41, 0.0  ;;  %1635 = vrcp.f32 %v1685_v26 }
  0x7b   :  { %v658_v3 = vadd.f32 %v657_v60, %v656_v27  ;;  %v1687_v60 = vmov 27  }
  0x7d   :  { %v2003_v58 = vpop.permute.xlu1 %852 }
  0x7e   :  { %1608 = vset.pattern.permute.xlu1 %v1675_v51  ;;  %v1975_v55 = vpop.permute.xlu2 %900 }
  0x7f   :  { %1157 = vperm.xlu1 %1608, %v1931_v29  }
  0x80   :  { %1000 = vperm.xlu0 %1597, %v1716_v1   ;;  %708 = vrot.lane.b32.xlu2 %v1909_v17, %s1674_s18 }
  0x86   :  { %v1977_v10 = vpop.permute.xlu2 %916 }
  0x87   :  { %1611 = vset.pattern.permute.xlu1 %v1677_v19 }
  0x88   :  { %1600 = vset.pattern.permute.xlu0 %v1676_v38  ;;  %726 = vrot.lane.b32.xlu2 %v1950_v31, %s1674_s18 }
  0x89   :  { %1036 = vperm.xlu0 %1600, %v1716_v1  }
  0x8e   :  { %v1979_v21 = vpop.permute.xlu2 %932 }
  0x90   :  { %728 = vrot.lane.b32.xlu2 %v1960_v61, %s1674_s18 }
  0x91   :  { %1165 = vperm.xlu0 %1600, %v1931_v29  }
  0x96   :  { %v1985_v6 = vpop.permute.xlu2 %948 }
  0x98   :  { %734 = vrot.lane.b32.xlu2 %v1950_v31, %s1672_s0 }
  0x99   :  { %736 = vrot.lane.b32.xlu0 %v1960_v61, %s1672_s0 }
  0x9a   :  { %1609 = vset.pattern.permute.xlu0 %v1683_v53 }
  0xa0   :  { %980 = vperm.xlu2 %1595, %v1716_v1   ;;  %v1999_v18 = vpop.permute.xlu2 %964 }
  0xa8   :  { %1598 = vset.pattern.permute.xlu2 %v2501_v37 }
  0xa9   :  { %679 = vadd.xlane.f32.xlu1 %v678_v56  ;;  %1010 = vperm.xlu2 %1598, %v1716_v1  }
  0xb1   :  { %1601 = vset.pattern.permute.xlu2 %v1682_v39 }
  0xb2   :  { %1052 = vperm.xlu2 %1601, %v1716_v1  }
  0xba   :  { %1602 = vset.pattern.permute.xlu2 %v1675_v51 }
  0xbb   :  { %1068 = vperm.xlu2 %1602, %v1716_v1  }
  0xc2   :  { %1261 = vperm.xlu1 %1611, %v1931_v29  }
  0xc3   :  { %644 = vadd.xlane.f32.xlu0 %v643_v45  ;;  %1603 = vset.pattern.permute.xlu2 %v1683_v53  ;;  %v1686_v45 = vmov 24  }
  0xc4   :  { %1084 = vperm.xlu2 %1603, %v1716_v1  }
  0xca   :  { %1614 = vset.pattern.permute.xlu1 %v1679_v16 }
  0xcb   :  { %1213 = vperm.xlu1 %1614, %v1931_v29   ;;  %659 = vadd.xlane.f32.xlu0 %v658_v3 }
  0xcc   :  { %1604 = vset.pattern.permute.xlu2 %v1679_v16 }
  0xcd   :  { %1100 = vperm.xlu2 %1604, %v1716_v1  }
  0xd2   :  { %v707_v11 = vpop.permute.xlu2 %706 }
  0xd3   :  { %1616 = vset.pattern.permute.xlu1 %v1681_v23 }
  0xd4   :  { %1229 = vperm.xlu1 %1616, %v1931_v29  }
  0xd5   :  { %1605 = vset.pattern.permute.xlu2 %v1681_v23 }
  0xd6   :  { %1116 = vperm.xlu2 %1605, %v1716_v1  }
  0xd7   :  { %v717_v46 = vpop.permute.xlu1 %716 }
  0xda   :  { %v709_v42 = vpop.permute.xlu2 %708 }
  0xdb   :  { %v713_v48 = vadd.f32 %v709_v42, %v1909_v17 }
  0xdc   :  { %1621 = vset.pattern.permute.xlu1 %v1666_v7  ;;  %v712_v7 = vadd.f32 %v707_v11, %v1922_v49  ;;  %v686_v49 = vadd.f32 %v685_v4, %v684_v57 }
  0xdd   :  { %v2011_v59 = vadd.f32 %v717_v46, %v713_v48 }
  0xde   :  { %1606 = vset.pattern.permute.xlu2 %v1684_v28 }
  0xdf   :  { %1181 = vperm.xlu0 %1609, %v1931_v29   ;;  %1132 = vperm.xlu2 %1606, %v1716_v1   ;;  %v1636_v1 = vpop.eup %1635  ;;  %v2043_v22 = vpop.permute.xlu1 %990 }
  0xe0   :  { %v647_v35 = vmul.f32 32.0, %v1636_v1  ;;  %vm651_vm11 = vweird.f32 %v1636_v1 }
  0xe2   :  { %v727_v13 = vpop.permute.xlu2 %726 }
  0xe3   :  { %v732_v27 = vadd.f32 %v727_v13, %v1950_v31 }
  0xe7   :  { %1612 = vset.pattern.permute.xlu0 %v1682_v39  ;;  %1607 = vset.pattern.permute.xlu2 %v1673_v44  ;;  %v648_v44 = vsub.f32 1.0, %v647_v35 }
  0xe8   :  { %1197 = vperm.xlu0 %1612, %v1931_v29   ;;  %1149 = vperm.xlu2 %1607, %v1931_v29   ;;  %v2049_v11 = vpop.permute.xlu1 %1020 }
  0xe9   :  { %v649_v32 = vmul.f32 %v1636_v1, %v648_v44 }
  0xea   :  { %v715_v17 = vpop.permute.xlu0 %714  ;;  %v729_v52 = vpop.permute.xlu2 %728 }
  0xeb   :  { %v2019_v51 = vadd.f32 %v715_v17, %v712_v7  ;;  %v733_v2 = vadd.f32 %v729_v52, %v1960_v61  ;;  %v650_v16 = vadd.f32 %v1636_v1, %v649_v32 }
  0xed   :  { %v652_v39 = vsel %vm651_vm11, %v1636_v1, %v650_v16 }
  0xf0   :  { %1610 = vset.pattern.permute.xlu2 %v1684_v28 }
  0xf1   :  { %1245 = vperm.xlu2 %1610, %v1931_v29   ;;  %v2052_v31 = vpop.permute.xlu1 %1157 }
  0xf2   :  { %v2029_v50 = vpop.permute.xlu0 %1000  ;;  %v735_v61 = vpop.permute.xlu2 %734 }
  0xf3   :  { %v2047_v3 = vadd.f32 %v735_v61, %v732_v27 }
  0xf9   :  { %1613 = vset.pattern.permute.xlu2 %v1686_v45 }
  0xfa   :  { %1277 = vperm.xlu2 %1613, %v1931_v29  }
  0xfb   :  { %v2032_v38 = vpop.permute.xlu0 %1036 }
  0xfe   :  { %687 = vadd.xlane.f32.xlu1 %v686_v49 }
 0x102   :  { %1615 = vset.pattern.permute.xlu2 %v1687_v60 }
 0x103   :  { %v2036_v14 = vpop.permute.xlu0 %1165  ;;  %1293 = vperm.xlu2 %1615, %v1931_v29  }
 0x10b   :  { %v737_v56 = vpop.permute.xlu0 %736  ;;  %1619 = vset.pattern.permute.xlu2 %v1653_v0 }
 0x10c   :  { %v2040_v19 = vadd.f32 %v737_v56, %v733_v2 }
 0x11c   :  { %v680_v54 = vpop.xlane.xlu1 %679 }
 0x11d   :  { %v681_v45 = vmul.f32 %v680_v54, %v652_v39  ;;  %v1651_v54 = vld [vmem:[%s2493_s2] sm:$0xf] }
 0x11f   :  { %v690_v32 = vmul.f32 %v681_v45, %v681_v45 }
 0x134   :  { %v2054_v28 = vpop.permute.xlu1 %1261 }
 0x136   :  { %v645_v23 = vpop.xlane.xlu0 %644 }
 0x137   :  { %v653_v42 = vmul.f32 %v652_v39, %v645_v23 }
 0x139   :  { %v662_v46 = vmul.f32 %v653_v42, %v653_v42 }
 0x13d   :  { %v2057_v26 = vpop.permute.xlu1 %1213 }
 0x13e   :  { %v660_v48 = vpop.xlane.xlu0 %659 }
 0x13f   :  { %v661_v53 = vmul.f32 %v660_v48, %v652_v39 }
 0x141   :  { %v663_v7 = vsub.f32 %v661_v53, %v662_v46 }
 0x143   :  { %v664_v17 = vmax.f32 %v663_v7, 0.0 }
 0x145   :  { %v665_v41 = vadd.f32 1e-05, %v664_v17 }
 0x146   :  { %v2062_v35 = vpop.permute.xlu1 %1229 }
 0x147   :  { %1637 = vrsqrt.f32 %v665_v41  ;;  %vm672_vm12 = vweird.f32 %v665_v41 }
 0x14d   :  { %v1638_v57 = vpop.eup %1637 }
 0x14e   :  { %v667_v4 = vmul.f32 %v1638_v57, %v665_v41  ;;  %vm673_vm13 = vweird.f32 %v1638_v57  ;;  %v1690_v41 = vmov 2  }
 0x14f   :  { %vm674_vm14 = vmor %vm672_vm12, %vm673_vm13 }
 0x150   :  { %v668_v49 = vmul.f32 %v1638_v57, %v667_v4  ;;  %v723_v4 = vmul.f32 0.33333334, %v2011_v59 }
 0x152   :  { %v669_v13 = vmul.f32 0.5, %v668_v49 }
 0x154   :  { %v670_v52 = vsub.f32 1.5, %v669_v13 }
 0x156   :  { %v671_v0 = vmul.f32 %v1638_v57, %v670_v52 }
 0x158   :  { %v675_v2 = vsel %vm674_vm14, %v1638_v57, %v671_v0  ;;  %v2072_v57 = vpop.permute.xlu2 %980 }
 0x159   :  { %v744_v56 = vmul.f32 %v675_v2, %v1931_v29 }
 0x15b   :  { %787 = vperm.xlu1 %1621, %v744_v56   ;;  %747 = vperm.xlu2 %1619, %v744_v56   ;;  %v752_v1 = vmul.f32 %v744_v56, %v653_v42 }
 0x160   :  { %v2076_v0 = vpop.permute.xlu2 %1010 }
 0x163   :  { %754 = vrot.lane.b32.xlu1 %v752_v1, %s1688_s21  ;;  %1620 = vset.pattern.permute.xlu2 %v1654_v9 }
 0x164   :  { %1625 = vset.pattern.permute.xlu1 %v1669_v62 }
 0x168   :  { %v2079_v56 = vpop.permute.xlu2 %1052 }
 0x170   :  { %v2082_v1 = vpop.permute.xlu2 %1068 }
 0x171   :  { %v688_v44 = vpop.xlane.xlu1 %687 }
 0x172   :  { %v689_v27 = vmul.f32 %v688_v44, %v652_v39  ;;  %v1689_v39 = vmov 25  }
 0x173   :  { %1617 = vset.pattern.permute.xlu0 %v1689_v39 }
 0x174   :  { %v691_v60 = vsub.f32 %v689_v27, %v690_v32  ;;  %1237 = vperm.xlu0 %1617, %v1931_v29  }
 0x176   :  { %v692_v61 = vmax.f32 %v691_v60, 0.0 }
 0x178   :  { %v693_v16 = vadd.f32 1e-05, %v692_v61  ;;  %v2085_v59 = vpop.permute.xlu2 %1084 }
 0x17a   :  { %1639 = vrsqrt.f32 %v693_v16  ;;  %vm700_vm0 = vweird.f32 %v693_v16 }
 0x17c   :  { %1618 = vset.pattern.permute.xlu0 %v1690_v41 }
 0x17d   :  { %832 = vperm.xlu0 %1618, %v1651_v54  }
 0x180   :  { %v1640_v23 = vpop.eup %1639 }
 0x181   :  { %v695_v46 = vmul.f32 %v1640_v23, %v693_v16  ;;  %vm701_vm15 = vweird.f32 %v1640_v23 }
 0x182   :  { %vm702_vm1 = vmor %vm700_vm0, %vm701_vm15  ;;  %vm1512_vm0 = vcmask 97280  }
 0x183   :  { %v696_v42 = vmul.f32 %v1640_v23, %v695_v46 }
 0x185   :  { %v697_v48 = vmul.f32 0.5, %v696_v42 }
 0x187   :  { %v698_v53 = vsub.f32 1.5, %v697_v48 }
 0x189   :  { %v699_v9 = vmul.f32 %v1640_v23, %v698_v53 }
 0x18b   :  { %v703_v62 = vsel %vm702_vm1, %v1640_v23, %v699_v9 }
 0x18c   :  { %v765_v7 = vmul.f32 %v703_v62, %v1931_v29 }
 0x18e   :  { %768 = vperm.xlu2 %1620, %v765_v7   ;;  %v773_v17 = vmul.f32 %v765_v7, %v681_v45 }
 0x190   :  { %775 = vrot.lane.b32.xlu1 %v773_v17, %s1688_s21 }
 0x196   :  { %1622 = vset.pattern.permute.xlu2 %v1667_v47  ;;  %v722_v47 = vmul.f32 0.33333334, %v2019_v51  ;;  %v2087_v51 = vpop.permute.xlu2 %1100 }
 0x197   :  { %799 = vperm.xlu2 %1622, %v765_v7  }
 0x19e   :  { %v2090_v32 = vpop.permute.xlu2 %1116 }
 0x19f   :  { %1623 = vset.pattern.permute.xlu2 %v1655_v15 }
 0x1cd   :  { %v788_v49 = vpop.permute.xlu1 %787 }
 0x1ce   :  { %v790_v13 = vmul.f32 %v788_v49, %v722_v47  ;;  %v791_v52 = vmul.f32 %v788_v49, %v723_v4 }
 0x1d5   :  { %v755_v2 = vpop.permute.xlu1 %754 }
 0x1d6   :  { %v757_v15 = vsub.f32 %v1931_v29, %v755_v2 }
 0x1d8   :  { %760 = vperm.xlu0 %1618, %v757_v15  }
 0x1e0   :  { %1624 = vset.pattern.permute.xlu0 %v1668_v30  ;;  %v2094_v30 = vpop.permute.xlu2 %1132 }
 0x1e1   :  { %793 = vperm.xlu0 %1624, %v757_v15  }
 0x1e8   :  { %v2096_v27 = vpop.permute.xlu2 %1149 }
 0x1e9   :  { %1629 = vset.pattern.permute.xlu0 %v1663_v43  ;;  %v2098_v43 = vpop.permute.xlu0 %1181 }
 0x1f0   :  { %v2100_v60 = vpop.permute.xlu2 %1245 }
 0x1f1   :  { %v2102_v61 = vpop.permute.xlu0 %1197 }
 0x1f8   :  { %v2104_v16 = vpop.permute.xlu2 %1277 }
 0x200   :  { %v2108_v23 = vpop.permute.xlu2 %1293 }
 0x201   :  { %2504 = vst [vmem:[#allocation2_spill] sm:$0xff] %v2108_v23 }
 0x202   :  { %v776_v45 = vpop.permute.xlu1 %775 }
 0x203   :  { %v778_v44 = vsub.f32 %v1931_v29, %v776_v45  ;;  %v2106_v29 = vpop.permute.xlu0 %1237 }
 0x205   :  { %805 = vperm.xlu1 %1625, %v778_v44   ;;  %781 = vperm.xlu2 %1623, %v778_v44  }
 0x20b   :  { %v833_v46 = vpop.permute.xlu0 %832 }
 0x20d   :  { %1626 = vset.pattern.permute.xlu1 %v1678_v34  ;;  %1627 = vset.pattern.permute.xlu2 %v1657_v25  ;;  %v748_v34 = vpop.permute.xlu2 %747 }
 0x20e   :  { %v750_v42 = vmul.f32 %v748_v34, %v722_v47  ;;  %v751_v53 = vmul.f32 %v748_v34, %v723_v4 }
 0x215   :  { %v769_v25 = vpop.permute.xlu2 %768 }
 0x21d   :  { %v800_v2 = vpop.permute.xlu2 %799 }
 0x24a   :  { %v761_v48 = vpop.permute.xlu0 %760 }
 0x24b   :  { %v763_v9 = vadd.f32 %v761_v48, %v750_v42  ;;  %v764_v62 = vadd.f32 %v761_v48, %v751_v53 }
 0x24d   :  { %v2110_v7 = vperm.slane %v763_v9, 0  ;;  %v2112_v17 = vperm.slane %v763_v9, 1  ;;  %v2114_v39 = vperm.slane %v763_v9, 2  ;;  %v2116_v41 = vperm.slane %v764_v62, 2 }
 0x24e   :  { %v2118_v54 = vperm.slane %v764_v62, 0  ;;  %v2120_v49 = vperm.slane %v764_v62, 1  ;;  %v2131_v42 = vperm.slane %v763_v9, 3  ;;  %v2144_v9 = vperm.slane %v764_v62, 3 }
 0x24f   :  { %v817_v47 = vmul.f32 %v2110_v7, %v1939_v8  ;;  %v827_v4 = vmul.f32 %v2112_v17, %v1996_v36  ;;  %v837_v45 = vmul.f32 %v2114_v39, %v833_v46  ;;  %v838_v63 = vmul.f32 %v2116_v41, %v833_v46 }
 0x250   :  { %v818_v53 = vmul.f32 %v2118_v54, %v1939_v8  ;;  %v828_v12 = vmul.f32 %v2120_v49, %v1996_v36  ;;  %v743_v8 = vmul.f32 0.33333334, %v2040_v19  ;;  %v847_v46 = vmul.f32 %v2131_v42, %v1957_v33 }
 0x251   :  { %v829_v48 = vadd.f32 %v827_v4, %v817_v47 }
 0x252   :  { %v830_v47 = vadd.f32 %v828_v12, %v818_v53  ;;  %v772_v24 = vmul.f32 %v769_v25, %v743_v8 }
 0x253   :  { %v794_v15 = vpop.permute.xlu0 %793  ;;  %v839_v36 = vadd.f32 %v837_v45, %v829_v48 }
 0x254   :  { %v2127_v44 = vadd.f32 %v794_v15, %v790_v13  ;;  %v2129_v34 = vadd.f32 %v794_v15, %v791_v52  ;;  %v742_v15 = vmul.f32 0.33333334, %v2047_v3  ;;  %v840_v37 = vadd.f32 %v838_v63, %v830_v47 }
 0x255   :  { %v2153_v62 = vadd.f32 %v847_v46, %v839_v36 }
 0x256   :  { %v1169_v20 = vmul.f32 %v2036_v14, %v2129_v34  ;;  %v1200_v13 = vmul.f32 %v2102_v61, %v2127_v44  ;;  %v1168_v52 = vmul.f32 %v2036_v14, %v2127_v44  ;;  %v771_v4 = vmul.f32 %v769_v25, %v742_v15 }
 0x257   :  { %2505 = vst [vmem:[#allocation3_spill] sm:$0xff] %v2153_v62  ;;  %v1281_v19 = vmul.f32 %v2104_v16, %v2129_v34 }
 0x258   :  { %1174 = vrot.lane.b32.xlu1 %v1169_v20, %s1674_s18  ;;  %1204 = vrot.lane.b32.xlu0 %v1200_v13, %s1672_s0  ;;  %v848_v20 = vmul.f32 %v2144_v9, %v1957_v33 }
 0x259   :  { %1172 = vrot.lane.b32.xlu2 %v1168_v52, %s1674_s18 }
 0x25a   :  { %v2157_v23 = vadd.f32 %v848_v20, %v840_v37 }
 0x25f   :  { %v782_v14 = vpop.permute.xlu2 %781 }
 0x260   :  { %v784_v3 = vadd.f32 %v782_v14, %v771_v4  ;;  %v785_v13 = vadd.f32 %v782_v14, %v772_v24  ;;  %1286 = vrot.lane.b32.xlu0 %v1281_v19, %s1672_s0  ;;  %v888_v14 = vmul.f32 %v1965_v5, %v2116_v41 }
 0x262   :  { %v2161_v45 = vperm.slane %v784_v3, 0  ;;  %v2163_v48 = vperm.slane %v784_v3, 1  ;;  %v2166_v12 = vperm.slane %v785_v13, 0  ;;  %v2168_v25 = vperm.slane %v785_v13, 1 }
 0x263   :  { %v2170_v63 = vperm.slane %v784_v3, 2  ;;  %v2172_v33 = vperm.slane %v785_v13, 2  ;;  %v2174_v24 = vperm.slane %v784_v3, 3  ;;  %v2180_v52 = vperm.slane %v785_v13, 3 }
 0x264   :  { %v985_v37 = vmul.f32 %v2161_v45, %v2072_v57  ;;  %v995_v53 = vmul.f32 %v2163_v48, %v2043_v22  ;;  %v986_v47 = vmul.f32 %v2166_v12, %v2072_v57  ;;  %v996_v4 = vmul.f32 %v2168_v25, %v2043_v22 }
 0x265   :  { %v1005_v46 = vmul.f32 %v2170_v63, %v2029_v50  ;;  %v1015_v3 = vmul.f32 %v2174_v24, %v2076_v0  ;;  %v1006_v13 = vmul.f32 %v2172_v33, %v2029_v50  ;;  %v1016_v57 = vmul.f32 %v2180_v52, %v2076_v0 }
 0x266   :  { %v997_v36 = vadd.f32 %v995_v53, %v985_v37  ;;  %v998_v19 = vadd.f32 %v996_v4, %v986_v47  ;;  %v803_v47 = vmul.f32 %v800_v2, %v743_v8  ;;  %v1153_v8 = vmul.f32 %v2096_v27, %v2129_v34 }
 0x268   :  { %v1007_v20 = vadd.f32 %v1005_v46, %v997_v36  ;;  %893 = vrot.lane.b32.xlu0 %v888_v14, %s1674_s18  ;;  %v1008_v53 = vadd.f32 %v1006_v13, %v998_v19  ;;  %v904_v36 = vmul.f32 %v1975_v55, %v2144_v9  ;;  %v802_v46 = vmul.f32 %v800_v2, %v742_v15 }
 0x269   :  { %v920_v14 = vmul.f32 %v1977_v10, %v2118_v54  ;;  %v1232_v19 = vmul.f32 %v2062_v35, %v2127_v44  ;;  %v1233_v13 = vmul.f32 %v2062_v35, %v2129_v34  ;;  %v1248_v35 = vmul.f32 %v2100_v60, %v2127_v44 }
 0x26a   :  { %v2195_v37 = vadd.f32 %v1015_v3, %v1007_v20  ;;  %v2199_v22 = vadd.f32 %v1016_v57, %v1008_v53  ;;  %v1152_v3 = vmul.f32 %v2096_v27, %v2127_v44 }
 0x270   :  { %909 = vrot.lane.b32.xlu0 %v904_v36, %s1674_s18 }
 0x277   :  { %v806_v4 = vpop.permute.xlu1 %805 }
 0x278   :  { %v2204_v62 = vadd.f32 %v806_v4, %v802_v46  ;;  %v2206_v50 = vadd.f32 %v806_v4, %v803_v47  ;;  %925 = vrot.lane.b32.xlu0 %v920_v14, %s1672_s0  ;;  %v936_v46 = vmul.f32 %v1979_v21, %v2120_v49  ;;  %v1249_v47 = vmul.f32 %v2100_v60, %v2129_v34 }
 0x279   :  { %v968_v60 = vmul.f32 %v1999_v18, %v2144_v9  ;;  %v855_v9 = vmul.f32 %v2003_v58, %v2110_v7 }
 0x27a   :  { %v1185_v0 = vmul.f32 %v2098_v43, %v2206_v50  ;;  %v1184_v20 = vmul.f32 %v2098_v43, %v2204_v62  ;;  %v1160_v2 = vmul.f32 %v2052_v31, %v2204_v62  ;;  %v1161_v15 = vmul.f32 %v2052_v31, %v2206_v50 }
 0x27b   :  { %v1240_v43 = vmul.f32 %v2106_v29, %v2204_v62  ;;  %v1241_v53 = vmul.f32 %v2106_v29, %v2206_v50  ;;  %v952_v29 = vmul.f32 %v1985_v6, %v2116_v41  ;;  %v1265_v4 = vmul.f32 %v2054_v28, %v2206_v50 }
 0x27c   :  { %1190 = vrot.lane.b32.xlu1 %v1185_v0, %s1674_s18  ;;  %1188 = vrot.lane.b32.xlu2 %v1184_v20, %s1674_s18  ;;  %v1162_v31 = vadd.f32 %v1160_v2, %v1152_v3  ;;  %v2233_v27 = vadd.f32 %v1161_v15, %v1153_v8  ;;  %v1264_v14 = vmul.f32 %v2054_v28, %v2204_v62 }
 0x27d   :  { %v2235_v57 = vadd.f32 %v1240_v43, %v1232_v19  ;;  %v2237_v36 = vadd.f32 %v1241_v53, %v1233_v13  ;;  %v1280_v0 = vmul.f32 %v2104_v16, %v2127_v44  ;;  %v1201_v41 = vmul.f32 %v2102_v61, %v2129_v34 }
 0x27e   :  { %v1056_v28 = vmul.f32 %v2079_v56, %v2172_v33  ;;  %v856_v20 = vmul.f32 %v2003_v58, %v2118_v54  ;;  %v1072_v61 = vmul.f32 %v2082_v1, %v2180_v52  ;;  %v872_v16 = vmul.f32 %v2014_v40, %v2120_v49 }
 0x27f   :  { %v871_v44 = vmul.f32 %v2014_v40, %v2112_v17  ;;  %v1088_v58 = vmul.f32 %v2085_v59, %v2166_v12  ;;  %v887_v54 = vmul.f32 %v1965_v5, %v2114_v39  ;;  %v1023_v34 = vmul.f32 %v2049_v11, %v2161_v45 }
 0x280   :  { %941 = vrot.lane.b32.xlu0 %v936_v46, %s1672_s0  ;;  %v1104_v40 = vmul.f32 %v2087_v51, %v2168_v25  ;;  %v903_v49 = vmul.f32 %v1975_v55, %v2131_v42  ;;  %v1039_v3 = vmul.f32 %v2032_v38, %v2163_v48  ;;  %v1120_v15 = vmul.f32 %v2090_v32, %v2172_v33  ;;  %v2506_v33 = vld [vmem:[#allocation2_spill] sm:$0xff] }
 0x281   :  { %v919_v8 = vmul.f32 %v1977_v10, %v2110_v7  ;;  %v1216_v55 = vmul.f32 %v2057_v26, %v2204_v62  ;;  %v1136_v19 = vmul.f32 %v2094_v30, %v2180_v52  ;;  %v935_v43 = vmul.f32 %v1979_v21, %v2112_v17 }
 0x282   :  { %v1297_v13 = vmul.f32 %v2506_v33, %v2206_v50  ;;  %v1296_v10 = vmul.f32 %v2506_v33, %v2204_v62  ;;  %v951_v7 = vmul.f32 %v1985_v6, %v2114_v39  ;;  %v967_v53 = vmul.f32 %v1999_v18, %v2131_v42 }
 0x283   :  { %v1024_v62 = vmul.f32 %v2049_v11, %v2166_v12  ;;  %v1055_v42 = vmul.f32 %v2079_v56, %v2170_v63  ;;  %v1087_v56 = vmul.f32 %v2085_v59, %v2161_v45  ;;  %v1119_v59 = vmul.f32 %v2090_v32, %v2170_v63 }
 0x284   :  { %1254 = vrot.lane.b32.xlu1 %v1249_v47, %s1674_s18  ;;  %1252 = vrot.lane.b32.xlu2 %v1248_v35, %s1674_s18  ;;  %v1217_v63 = vmul.f32 %v2057_v26, %v2206_v50 }
 0x288   :  { %957 = vrot.lane.b32.xlu0 %v952_v29, %s1672_s0  ;;  %v1040_v29 = vmul.f32 %v2032_v38, %v2168_v25 }
 0x28c   :  { %1270 = vrot.lane.b32.xlu1 %v1265_v4, %s1674_s18  ;;  %1268 = vrot.lane.b32.xlu2 %v1264_v14, %s1674_s18 }
 0x290   :  { %973 = vrot.lane.b32.xlu0 %v968_v60, %s1672_s0 }
 0x294   :  { %1284 = vrot.lane.b32.xlu1 %v1280_v0, %s1672_s0  ;;  %1206 = vrot.lane.b32.xlu2 %v1201_v41, %s1672_s0  ;;  %v1071_v0 = vmul.f32 %v2082_v1, %v2174_v24  ;;  %v1103_v1 = vmul.f32 %v2087_v51, %v2163_v48  ;;  %v1135_v51 = vmul.f32 %v2094_v30, %v2174_v24 }
 0x298   :  { %1061 = vrot.lane.b32.xlu0 %v1056_v28, %s1674_s18 }
 0x29c   :  { %861 = vrot.lane.b32.xlu1 %v856_v20, %s1674_s18  ;;  %859 = vrot.lane.b32.xlu2 %v855_v9, %s1674_s18 }
 0x2a0   :  { %1077 = vrot.lane.b32.xlu0 %v1072_v61, %s1674_s18 }
 0x2a4   :  { %877 = vrot.lane.b32.xlu1 %v872_v16, %s1674_s18  ;;  %875 = vrot.lane.b32.xlu2 %v871_v44, %s1674_s18 }
 0x2a8   :  { %1093 = vrot.lane.b32.xlu0 %v1088_v58, %s1672_s0 }
 0x2ac   :  { %891 = vrot.lane.b32.xlu1 %v887_v54, %s1674_s18  ;;  %1027 = vrot.lane.b32.xlu2 %v1023_v34, %s1674_s18 }
 0x2b0   :  { %1109 = vrot.lane.b32.xlu0 %v1104_v40, %s1672_s0 }
 0x2b3   :  { %v1173_v5 = vpop.permute.xlu2 %1172 }
 0x2b4   :  { %907 = vrot.lane.b32.xlu1 %v903_v49, %s1674_s18  ;;  %1043 = vrot.lane.b32.xlu2 %v1039_v3, %s1674_s18  ;;  %v1178_v2 = vadd.f32 %v1173_v5, %v1162_v31 }
 0x2b8   :  { %1125 = vrot.lane.b32.xlu0 %v1120_v15, %s1672_s0 }
 0x2bc   :  { %923 = vrot.lane.b32.xlu1 %v919_v8, %s1672_s0  ;;  %1220 = vrot.lane.b32.xlu2 %v1216_v55, %s1672_s0 }
 0x2c0   :  { %1141 = vrot.lane.b32.xlu0 %v1136_v19, %s1672_s0 }
 0x2c4   :  { %939 = vrot.lane.b32.xlu1 %v935_v43, %s1672_s0  ;;  %1302 = vrot.lane.b32.xlu2 %v1297_v13, %s1672_s0 }
 0x2c8   :  { %1300 = vrot.lane.b32.xlu0 %v1296_v10, %s1672_s0 }
 0x2ca   :  { %v1175_v21 = vpop.permute.xlu1 %1174  ;;  %v1205_v17 = vpop.permute.xlu0 %1204 }
 0x2cb   :  { %v1179_v52 = vadd.f32 %v1175_v21, %v2233_v27 }
 0x2cc   :  { %955 = vrot.lane.b32.xlu1 %v951_v7, %s1672_s0 }
 0x2d2   :  { %v1287_v31 = vpop.permute.xlu0 %1286 }
 0x2d4   :  { %971 = vrot.lane.b32.xlu1 %v967_v53, %s1672_s0 }
 0x2d6   :  { %v1189_v46 = vpop.permute.xlu2 %1188 }
 0x2d7   :  { %v1194_v47 = vadd.f32 %v1189_v46, %v1178_v2 }
 0x2d9   :  { %v1210_v6 = vadd.f32 %v1205_v17, %v1194_v47 }
 0x2da   :  { %v894_v39 = vpop.permute.xlu0 %893 }
 0x2dc   :  { %1029 = vrot.lane.b32.xlu1 %v1024_v62, %s1674_s18 }
 0x2de   :  { %v1253_v35 = vpop.permute.xlu2 %1252 }
 0x2df   :  { %v1258_v53 = vadd.f32 %v1253_v35, %v2235_v57 }
 0x2e2   :  { %v910_v27 = vpop.permute.xlu0 %909 }
 0x2e4   :  { %1045 = vrot.lane.b32.xlu1 %v1040_v29, %s1674_s18 }
 0x2e6   :  { %v1269_v18 = vpop.permute.xlu2 %1268 }
 0x2e7   :  { %v1274_v50 = vadd.f32 %v1269_v18, %v1258_v53 }
 0x2ea   :  { %v926_v4 = vpop.permute.xlu0 %925 }
 0x2ec   :  { %1059 = vrot.lane.b32.xlu1 %v1055_v42, %s1674_s18 }
 0x2ee   :  { %v1191_v14 = vpop.permute.xlu1 %1190  ;;  %v1207_v12 = vpop.permute.xlu2 %1206 }
 0x2ef   :  { %v1195_v11 = vadd.f32 %v1191_v14, %v1179_v52 }
 0x2f1   :  { %v2339_v60 = vadd.f32 %v1207_v12, %v1195_v11 }
 0x2f2   :  { %v942_v38 = vpop.permute.xlu0 %941 }
 0x2f4   :  { %1075 = vrot.lane.b32.xlu1 %v1071_v0, %s1674_s18 }
 0x2f6   :  { %v1255_v25 = vpop.permute.xlu1 %1254  ;;  %v860_v28 = vpop.permute.xlu2 %859 }
 0x2f7   :  { %v1259_v41 = vadd.f32 %v1255_v25, %v2237_v36 }
 0x2fa   :  { %v958_v20 = vpop.permute.xlu0 %957 }
 0x2fc   :  { %1091 = vrot.lane.b32.xlu1 %v1087_v56, %s1672_s0 }
 0x2fe   :  { %v1271_v9 = vpop.permute.xlu1 %1270  ;;  %v876_v16 = vpop.permute.xlu2 %875 }
 0x2ff   :  { %v1275_v61 = vadd.f32 %v1271_v9, %v1259_v41 }
 0x301   :  { %v1291_v44 = vadd.f32 %v1287_v31, %v1275_v61  ;;  %v2507_v31 = vld [vmem:[#allocation3_spill] sm:$0xff] }
 0x302   :  { %v974_v58 = vpop.permute.xlu0 %973  ;;  %v865_v26 = vadd.f32 %v860_v28, %v2507_v31 }
 0x304   :  { %1107 = vrot.lane.b32.xlu1 %v1103_v1, %s1672_s0  ;;  %v881_v46 = vadd.f32 %v876_v16, %v865_v26 }
 0x306   :  { %v1285_v54 = vpop.permute.xlu1 %1284  ;;  %v1028_v34 = vpop.permute.xlu2 %1027 }
 0x307   :  { %v1033_v36 = vadd.f32 %v1028_v34, %v2195_v37  ;;  %v1290_v62 = vadd.f32 %v1285_v54, %v1274_v50 }
 0x30a   :  { %v1062_v45 = vpop.permute.xlu0 %1061 }
 0x30c   :  { %1123 = vrot.lane.b32.xlu1 %v1119_v59, %s1672_s0 }
 0x30e   :  { %v862_v40 = vpop.permute.xlu1 %861  ;;  %v1044_v49 = vpop.permute.xlu2 %1043 }
 0x30f   :  { %v2355_v3 = vadd.f32 %v1044_v49, %v1033_v36  ;;  %v866_v48 = vadd.f32 %v862_v40, %v2157_v23 }
 0x312   :  { %v1078_v5 = vpop.permute.xlu0 %1077 }
 0x314   :  { %1139 = vrot.lane.b32.xlu1 %v1135_v51, %s1672_s0 }
 0x316   :  { %v878_v2 = vpop.permute.xlu1 %877  ;;  %v1221_v15 = vpop.permute.xlu2 %1220 }
 0x317   :  { %v882_v37 = vadd.f32 %v878_v2, %v866_v48  ;;  %v2361_v8 = vadd.f32 %v1221_v15, %v1210_v6 }
 0x319   :  { %v898_v32 = vadd.f32 %v894_v39, %v882_v37 }
 0x31a   :  { %v1094_v43 = vpop.permute.xlu0 %1093 }
 0x31b   :  { %v914_v55 = vadd.f32 %v910_v27, %v898_v32 }
 0x31c   :  { %1222 = vrot.lane.b32.xlu1 %v1217_v63, %s1672_s0 }
 0x31d   :  { %v930_v19 = vadd.f32 %v926_v4, %v914_v55 }
 0x31e   :  { %v892_v30 = vpop.permute.xlu1 %891  ;;  %v1303_v47 = vpop.permute.xlu2 %1302 }
 0x31f   :  { %v946_v24 = vadd.f32 %v942_v38, %v930_v19  ;;  %v897_v6 = vadd.f32 %v892_v30, %v881_v46  ;;  %v2370_v27 = vadd.f32 %v1303_v47, %v1291_v44 }
 0x321   :  { %v962_v33 = vadd.f32 %v958_v20, %v946_v24  ;;  %v1464_v35 = vsel %vm1308_vm2, %v2370_v27, 0.0  ;;  %v1470_v46 = vmul.f32 %v2370_v27, %v2370_v27 }
 0x322   :  { %v1110_v23 = vpop.permute.xlu0 %1109 }
 0x323   :  { %v2366_v13 = vadd.f32 %v974_v58, %v962_v33  ;;  %v1420_v33 = vmul.f32 %v2361_v8, %v2361_v8 }
 0x325   :  { %v1310_v41 = vsel %vm1308_vm2, %v2366_v13, 0.0 }
 0x326   :  { %v908_v10 = vpop.permute.xlu1 %907 }
 0x327   :  { %v913_v42 = vadd.f32 %v908_v10, %v897_v6  ;;  %v1414_v10 = vsel %vm1308_vm2, %v2361_v8, 0.0 }
 0x32a   :  { %v1126_v7 = vpop.permute.xlu0 %1125 }
 0x32e   :  { %v924_v21 = vpop.permute.xlu1 %923 }
 0x32f   :  { %v929_v14 = vadd.f32 %v924_v21, %v913_v42 }
 0x332   :  { %v1142_v17 = vpop.permute.xlu0 %1141 }
 0x336   :  { %v940_v52 = vpop.permute.xlu1 %939 }
 0x337   :  { %v945_v57 = vadd.f32 %v940_v52, %v929_v14 }
 0x33a   :  { %v1301_v39 = vpop.permute.xlu0 %1300 }
 0x33b   :  { %v2372_v4 = vadd.f32 %v1301_v39, %v1290_v62  ;;  %v1472_v39 = vsel %vm1308_vm2, %v1470_v46, 0.0 }
 0x33d   :  { %v1463_v11 = vsel %vm1308_vm2, %v2372_v4, 0.0  ;;  %v1469_v31 = vmul.f32 %v2372_v4, %v2372_v4 }
 0x33e   :  { %v956_v29 = vpop.permute.xlu1 %955  ;;  %v1465_v18 = vadd.f32 %v1464_v35, %v1463_v11  ;;  %v1691_v11 = vmov 24.0  }
 0x33f   :  { %v961_v12 = vadd.f32 %v956_v29, %v945_v57  ;;  %v1471_v62 = vsel %vm1308_vm2, %v1469_v31, 0.0  ;;  %1641 = vrcp.f32 %v1691_v11 }
 0x340   :  { %v1473_v42 = vadd.f32 %v1472_v39, %v1471_v62 }
 0x345   :  { %v1642_v57 = vpop.eup %1641 }
 0x346   :  { %v972_v0 = vpop.permute.xlu1 %971  ;;  %1466 = vadd.xlane.f32.xlu1 %v1465_v18  ;;  %v1315_v35 = vmul.f32 24.0, %v1642_v57  ;;  %vm1319_vm3 = vweird.f32 %v1642_v57 }
 0x347   :  { %v2378_v38 = vadd.f32 %v972_v0, %v961_v12 }
 0x348   :  { %v1316_v18 = vsub.f32 1.0, %v1315_v35  ;;  %v1652_v35 = vld [vmem:[%s2495_s1] sm:$0xf] }
 0x349   :  { %v1309_v25 = vsel %vm1308_vm2, %v2378_v38, 0.0  ;;  %v1322_v19 = vmul.f32 %v2378_v38, %v2378_v38 }
 0x34a   :  { %v1311_v28 = vadd.f32 %v1310_v41, %v1309_v25  ;;  %v1317_v0 = vmul.f32 %v1642_v57, %v1316_v18 }
 0x34b   :  { %v1324_v24 = vsel %vm1308_vm2, %v1322_v19, 0.0 }
 0x34c   :  { %v1318_v25 = vadd.f32 %v1642_v57, %v1317_v0 }
 0x34e   :  { %v1030_v56 = vpop.permute.xlu1 %1029  ;;  %1312 = vadd.xlane.f32.xlu1 %v1311_v28 }
 0x34f   :  { %v1034_v20 = vadd.f32 %v1030_v56, %v2199_v22  ;;  %v1320_v56 = vsel %vm1319_vm3, %v1642_v57, %v1318_v25 }
 0x356   :  { %v1046_v9 = vpop.permute.xlu1 %1045 }
 0x357   :  { %v1050_v61 = vadd.f32 %v1046_v9, %v1034_v20 }
 0x359   :  { %v1066_v16 = vadd.f32 %v1062_v45, %v1050_v61 }
 0x35b   :  { %v1082_v44 = vadd.f32 %v1078_v5, %v1066_v16 }
 0x35d   :  { %v1098_v1 = vadd.f32 %v1094_v43, %v1082_v44 }
 0x35e   :  { %v1060_v58 = vpop.permute.xlu1 %1059 }
 0x35f   :  { %v1114_v54 = vadd.f32 %v1110_v23, %v1098_v1  ;;  %v1065_v51 = vadd.f32 %v1060_v58, %v2355_v3  ;;  %v1323_v3 = vmul.f32 %v2366_v13, %v2366_v13 }
 0x361   :  { %v1130_v34 = vadd.f32 %v1126_v7, %v1114_v54  ;;  %v1325_v23 = vsel %vm1308_vm2, %v1323_v3, 0.0 }
 0x363   :  { %v2385_v36 = vadd.f32 %v1142_v17, %v1130_v34  ;;  %v1326_v17 = vadd.f32 %v1325_v23, %v1324_v24 }
 0x365   :  { %v1366_v5 = vsel %vm1308_vm2, %v2385_v36, 0.0  ;;  %v1372_v47 = vmul.f32 %v2385_v36, %v2385_v36 }
 0x366   :  { %v1076_v59 = vpop.permute.xlu1 %1075 }
 0x367   :  { %v1081_v2 = vadd.f32 %v1076_v59, %v1065_v51  ;;  %v1374_v29 = vsel %vm1308_vm2, %v1372_v47, 0.0 }
 0x36e   :  { %v1092_v40 = vpop.permute.xlu1 %1091 }
 0x36f   :  { %v1097_v37 = vadd.f32 %v1092_v40, %v1081_v2 }
 0x376   :  { %v1108_v49 = vpop.permute.xlu1 %1107 }
 0x377   :  { %v1113_v15 = vadd.f32 %v1108_v49, %v1097_v37 }
 0x37e   :  { %v1124_v48 = vpop.permute.xlu1 %1123 }
 0x37f   :  { %v1129_v22 = vadd.f32 %v1124_v48, %v1113_v15 }
 0x386   :  { %v1140_v32 = vpop.permute.xlu1 %1139 }
 0x387   :  { %v2388_v63 = vadd.f32 %v1140_v32, %v1129_v22 }
 0x389   :  { %v1365_v45 = vsel %vm1308_vm2, %v2388_v63, 0.0  ;;  %v1371_v26 = vmul.f32 %v2388_v63, %v2388_v63 }
 0x38a   :  { %v1367_v55 = vadd.f32 %v1366_v5, %v1365_v45 }
 0x38b   :  { %v1373_v6 = vsel %vm1308_vm2, %v1371_v26, 0.0 }
 0x38c   :  { %1368 = vadd.xlane.f32.xlu0 %v1367_v55  ;;  %v1375_v14 = vadd.f32 %v1374_v29, %v1373_v6 }
 0x38e   :  { %v1223_v43 = vpop.permute.xlu1 %1222 }
 0x38f   :  { %v2399_v30 = vadd.f32 %v1223_v43, %v2339_v60  ;;  %v1422_v60 = vsel %vm1308_vm2, %v1420_v33, 0.0 }
 0x391   :  { %v1415_v7 = vsel %vm1308_vm2, %v2399_v30, 0.0  ;;  %v1421_v21 = vmul.f32 %v2399_v30, %v2399_v30 }
 0x392   :  { %v1416_v52 = vadd.f32 %v1415_v7, %v1414_v10 }
 0x393   :  { %v1423_v53 = vsel %vm1308_vm2, %v1421_v21, 0.0 }
 0x394   :  { %1327 = vadd.xlane.f32.xlu0 %v1326_v17  ;;  %1417 = vadd.xlane.f32.xlu2 %v1416_v52  ;;  %v1424_v50 = vadd.f32 %v1423_v53, %v1422_v60 }
 0x396   :  { %1425 = vadd.xlane.f32.xlu1 %v1424_v50 }
 0x39c   :  { %1474 = vadd.xlane.f32.xlu0 %v1473_v42  ;;  %1376 = vadd.xlane.f32.xlu2 %v1375_v14 }
 0x3b9   :  { %v1467_v12 = vpop.xlane.xlu1 %1466 }
 0x3ba   :  { %v2429_v40 = vmul.f32 %v1467_v12, %v1320_v56 }
 0x3bc   :  { %v1477_v32 = vmul.f32 %v2429_v40, %v2429_v40 }
 0x3c1   :  { %v1313_v28 = vpop.xlane.xlu1 %1312 }
 0x3c2   :  { %v2425_v20 = vmul.f32 %v1320_v56, %v1313_v28 }
 0x3c4   :  { %v1330_v16 = vmul.f32 %v2425_v20, %v2425_v20 }
 0x3ff   :  { %v1369_v41 = vpop.xlane.xlu0 %1368 }
 0x400   :  { %v2431_v48 = vmul.f32 %v1369_v41, %v1320_v56 }
 0x402   :  { %v1379_v55 = vmul.f32 %v2431_v48, %v2431_v48 }
 0x407   :  { %v1328_v9 = vpop.xlane.xlu0 %1327  ;;  %v1418_v61 = vpop.xlane.xlu2 %1417 }
 0x408   :  { %v1329_v44 = vmul.f32 %v1328_v9, %v1320_v56  ;;  %v1419_v1 = vmul.f32 %v1418_v61, %v1320_v56 }
 0x409   :  { %v1426_v58 = vpop.xlane.xlu1 %1425 }
 0x40a   :  { %v1331_v54 = vsub.f32 %v1329_v44, %v1330_v16  ;;  %v1428_v34 = vmul.f32 %v1419_v1, %v1419_v1  ;;  %v1427_v59 = vmul.f32 %v1426_v58, %v1320_v56  ;;  %v2508_v58 = vmov 15  }
 0x40c   :  { %v1332_v49 = vmax.f32 %v1331_v54, 0.0  ;;  %v1429_v51 = vsub.f32 %v1427_v59, %v1428_v34 }
 0x40e   :  { %v1333_v2 = vadd.f32 1e-05, %v1332_v49  ;;  %v1430_v37 = vmax.f32 %v1429_v51, 0.0  ;;  %v2509_v49 = vmov 5  }
 0x40f   :  { %v1475_v15 = vpop.xlane.xlu0 %1474  ;;  %v1377_v22 = vpop.xlane.xlu2 %1376 }
 0x410   :  { %1643 = vrsqrt.f32 %v1333_v2  ;;  %v1431_v45 = vadd.f32 1e-05, %v1430_v37  ;;  %v1476_v5 = vmul.f32 %v1475_v15, %v1320_v56  ;;  %v1378_v19 = vmul.f32 %v1377_v22, %v1320_v56 }
 0x411   :  { %vm1340_vm8 = vweird.f32 %v1333_v2 }
 0x412   :  { %1645 = vrsqrt.f32 %v1431_v45  ;;  %v1478_v3 = vsub.f32 %v1476_v5, %v1477_v32  ;;  %v1380_v43 = vsub.f32 %v1378_v19, %v1379_v55  ;;  %vm1438_vm5 = vweird.f32 %v1431_v45 }
 0x413   :  { %v2511_v55 = vmov 14  }
 0x414   :  { %v1479_v24 = vmax.f32 %v1478_v3, 0.0  ;;  %v1381_v33 = vmax.f32 %v1380_v43, 0.0  ;;  %v2512_v43 = vmov 13  }
 0x416   :  { %v1644_v23 = vpop.eup %1643  ;;  %v1480_v10 = vadd.f32 1e-05, %v1479_v24  ;;  %v1382_v21 = vadd.f32 1e-05, %v1381_v33 }
 0x417   :  { %v1335_v7 = vmul.f32 %v1644_v23, %v1333_v2  ;;  %vm1341_vm6 = vweird.f32 %v1644_v23  ;;  %v2510_v2 = vmov 7  }
 0x418   :  { %v1646_v17 = vpop.eup %1645  ;;  %1647 = vrsqrt.f32 %v1480_v10  ;;  %vm1342_vm9 = vmor %vm1340_vm8, %vm1341_vm6  ;;  %vm1389_vm11 = vweird.f32 %v1382_v21  ;;  %vm1487_vm14 = vweird.f32 %v1480_v10 }
 0x419   :  { %v1336_v52 = vmul.f32 %v1644_v23, %v1335_v7  ;;  %v1433_v60 = vmul.f32 %v1646_v17, %v1431_v45  ;;  %1649 = vrsqrt.f32 %v1382_v21  ;;  %vm1439_vm4 = vweird.f32 %v1646_v17 }
 0x41a   :  { %vm1440_vm7 = vmor %vm1438_vm5, %vm1439_vm4 }
 0x41b   :  { %v1337_v53 = vmul.f32 0.5, %v1336_v52  ;;  %v1434_v31 = vmul.f32 %v1646_v17, %v1433_v60 }
 0x41d   :  { %v1338_v26 = vsub.f32 1.5, %v1337_v53  ;;  %v1435_v50 = vmul.f32 0.5, %v1434_v31 }
 0x41e   :  { %v1648_v46 = vpop.eup %1647 }
 0x41f   :  { %v1650_v47 = vpop.eup %1649  ;;  %v1436_v62 = vsub.f32 1.5, %v1435_v50  ;;  %v1482_v39 = vmul.f32 %v1648_v46, %v1480_v10  ;;  %v1339_v42 = vmul.f32 %v1644_v23, %v1338_v26  ;;  %vm1488_vm13 = vweird.f32 %v1648_v46 }
 0x420   :  { %v1384_v6 = vmul.f32 %v1650_v47, %v1382_v21  ;;  %vm1390_vm10 = vweird.f32 %v1650_v47  ;;  %vm1489_vm15 = vmor %vm1487_vm14, %vm1488_vm13 }
 0x421   :  { %v1437_v29 = vmul.f32 %v1646_v17, %v1436_v62  ;;  %v1483_v12 = vmul.f32 %v1648_v46, %v1482_v39  ;;  %v1343_v0 = vsel %vm1342_vm9, %v1644_v23, %v1339_v42  ;;  %vm1391_vm12 = vmor %vm1389_vm11, %vm1390_vm10 }
 0x422   :  { %v1385_v14 = vmul.f32 %v1650_v47, %v1384_v6  ;;  %v1344_v28 = vmul.f32 %v1652_v35, %v1343_v0 }
 0x423   :  { %v1441_v11 = vsel %vm1440_vm7, %v1646_v17, %v1437_v29  ;;  %v1484_v56 = vmul.f32 0.5, %v1483_v12 }
 0x424   :  { %v1386_v57 = vmul.f32 0.5, %v1385_v14  ;;  %v1442_v18 = vmul.f32 %v1652_v35, %v1441_v11  ;;  %v1352_v61 = vmul.f32 %v1344_v28, %v2425_v20 }
 0x425   :  { %v1485_v16 = vsub.f32 1.5, %v1484_v56 }
 0x426   :  { %v1387_v25 = vsub.f32 1.5, %v1386_v57  ;;  %1445 = vperm.xlu1 %1626, %v1442_v18   ;;  %v1450_v41 = vmul.f32 %v1442_v18, %v1419_v1 }
 0x427   :  { %v1486_v1 = vmul.f32 %v1648_v46, %v1485_v16 }
 0x428   :  { %1452 = vrot.lane.b32.xlu2 %v1450_v41, %s1688_s21  ;;  %v1388_v9 = vmul.f32 %v1650_v47, %v1387_v25 }
 0x429   :  { %v1490_v59 = vsel %vm1489_vm15, %v1648_v46, %v1486_v1 }
 0x42a   :  { %v1392_v44 = vsel %vm1391_vm12, %v1650_v47, %v1388_v9  ;;  %v1491_v20 = vmul.f32 %v1652_v35, %v1490_v59 }
 0x42b   :  { %v1393_v54 = vmul.f32 %v1652_v35, %v1392_v44 }
 0x42c   :  { %v1499_v51 = vmul.f32 %v1491_v20, %v2429_v40 }
 0x42d   :  { %v1401_v34 = vmul.f32 %v1393_v54, %v2431_v48 }
 0x42e   :  { %1354 = vrot.lane.b32.xlu1 %v1352_v61, %s1688_s21 }
 0x42f   :  { %1633 = vset.pattern.permute.xlu1 %v2508_v58 }
 0x430   :  { %1347 = vperm.xlu2 %1627, %v1344_v28  }
 0x436   :  { %1403 = vrot.lane.b32.xlu1 %v1401_v34, %s1688_s21 }
 0x438   :  { %1628 = vset.pattern.permute.xlu2 %v2509_v49 }
 0x439   :  { %1396 = vperm.xlu2 %1628, %v1393_v54  }
 0x43e   :  { %1501 = vrot.lane.b32.xlu1 %v1499_v51, %s1688_s21 }
 0x441   :  { %1630 = vset.pattern.permute.xlu2 %v2510_v2 }
 0x482   :  { %v1453_v32 = vpop.permute.xlu2 %1452 }
 0x483   :  { %v1455_v5 = vsub.f32 %v1652_v35, %v1453_v32 }
 0x48a   :  { %v1348_v40 = vpop.permute.xlu2 %1347 }
 0x493   :  { %v1397_v24 = vpop.permute.xlu2 %1396 }
 0x494   :  { %v1399_v33 = vmul.f32 %v1397_v24, %v2388_v63  ;;  %v1400_v23 = vmul.f32 %v1397_v24, %v2385_v36  ;;  %v1350_v63 = vmul.f32 %v1348_v40, %v2378_v38  ;;  %v1351_v36 = vmul.f32 %v1348_v40, %v2366_v13 }
 0x498   :  { %v1446_v37 = vpop.permute.xlu1 %1445 }
 0x499   :  { %v1448_v46 = vmul.f32 %v1446_v37, %v2361_v8  ;;  %v1449_v38 = vmul.f32 %v1446_v37, %v2399_v30 }
 0x4a0   :  { %v1355_v15 = vpop.permute.xlu1 %1354 }
 0x4a1   :  { %v1357_v22 = vsub.f32 %v1652_v35, %v1355_v15 }
 0x4a3   :  { %1360 = vperm.xlu0 %1629, %v1357_v22  }
 0x4a8   :  { %v1404_v45 = vpop.permute.xlu1 %1403 }
 0x4a9   :  { %v1406_v48 = vsub.f32 %v1652_v35, %v1404_v45 }
 0x4ab   :  { %1631 = vset.pattern.permute.xlu0 %v2511_v55  ;;  %1409 = vperm.xlu2 %1630, %v1406_v48  }
 0x4ac   :  { %1458 = vperm.xlu0 %1631, %v1455_v5  }
 0x4b0   :  { %v1502_v19 = vpop.permute.xlu1 %1501 }
 0x4b1   :  { %v1504_v3 = vsub.f32 %v1652_v35, %v1502_v19 }
 0x4b3   :  { %1632 = vset.pattern.permute.xlu2 %v2512_v43  ;;  %1507 = vperm.xlu1 %1633, %v1504_v3  }
 0x4b4   :  { %1494 = vperm.xlu2 %1632, %v1491_v20   ;;  %1634 = vset.pattern.permute.xlu0 %v2508_v58 }
 0x505   :  { %v1410_v10 = vpop.permute.xlu2 %1409 }
 0x506   :  { %v1412_v7 = vadd.f32 %v1410_v10, %v1399_v33  ;;  %v1413_v21 = vadd.f32 %v1410_v10, %v1400_v23 }
 0x508   :  { %v1517_v17 = vsel %vm1512_vm0, %v1412_v7, 0.0  ;;  %v1518_v52 = vsel %vm1512_vm0, %v1413_v21, 0.0 }
 0x509   :  { %1519 = vst [vmem:[%s2496_s3 + $0x4] sm:$0xf] %v1517_v17 }
 0x50a   :  { %1520 = vst [vmem:[%s2496_s3 + $0x14] sm:$0xf] %v1518_v52 }
 0x50e   :  { %v1495_v6 = vpop.permute.xlu2 %1494 }
 0x50f   :  { %v1497_v8 = vmul.f32 %v1495_v6, %v2372_v4  ;;  %v1498_v30 = vmul.f32 %v1495_v6, %v2370_v27 }
 0x515   :  { %v1361_v60 = vpop.permute.xlu0 %1360 }
 0x516   :  { %v1363_v53 = vadd.f32 %v1361_v60, %v1350_v63  ;;  %v1364_v31 = vadd.f32 %v1361_v60, %v1351_v36 }
 0x518   :  { %v1513_v26 = vsel %vm1512_vm0, %v1363_v53, 0.0  ;;  %v1514_v50 = vsel %vm1512_vm0, %v1364_v31, 0.0 }
 0x519   :  { %1515 = vst [vmem:[%s2496_s3] sm:$0xf] %v1513_v26 }
 0x51a   :  { %1516 = vst [vmem:[%s2496_s3 + $0x10] sm:$0xf] %v1514_v50 }
 0x51e   :  { %v1459_v13 = vpop.permute.xlu0 %1458 }
 0x51f   :  { %v1461_v47 = vadd.f32 %v1459_v13, %v1448_v46  ;;  %v1462_v62 = vadd.f32 %v1459_v13, %v1449_v38 }
 0x521   :  { %v1521_v39 = vsel %vm1512_vm0, %v1461_v47, 0.0  ;;  %v1522_v29 = vsel %vm1512_vm0, %v1462_v62, 0.0 }
 0x522   :  { %1523 = vst [vmem:[%s2496_s3 + $0x8] sm:$0xf] %v1521_v39 }
 0x523   :  { %1524 = vst [vmem:[%s2496_s3 + $0x18] sm:$0xf] %v1522_v29 }
 0x525   :  { %v1508_v42 = vpop.permute.xlu1 %1507 }
 0x526   :  { %v1510_v14 = vadd.f32 %v1508_v42, %v1497_v8  ;;  %v1511_v11 = vadd.f32 %v1508_v42, %v1498_v30 }
 0x528   :  { %v1525_v57 = vsel %vm1512_vm0, %v1510_v14, 0.0  ;;  %v1526_v35 = vsel %vm1512_vm0, %v1511_v11, 0.0 }
 0x529   :  { %1527 = vst [vmem:[%s2496_s3 + $0xc] sm:$0xf] %v1525_v57 }
 0x52a   :  { %1528 = vst [vmem:[%s2496_s3 + $0x1c] sm:$0xf] %v1526_v35 }

</bundles_post_ra>
